<compile_context>
chip_gen: v7x
topology: tpu7x:2x2x1
jax: 0.10.0
libtpu: 0.0.40
codegen_flags: <defaults>
</compile_context>

<pallas_src>
import functools

import numpy as np

import jax
import jax.numpy as jnp
from jax.experimental import pallas as pl
from jax.experimental.pallas import tpu as pltpu

BN_EPS = 1e-5
_PAD_TOP = 8   # interior rows start at an (8,128)-aligned sublane offset


def _round_up(x, m):
    return (x + m - 1) // m * m


def _full_spec(arr):
    zeros = (0,) * arr.ndim
    return pl.BlockSpec(arr.shape, lambda i: zeros)


# ----------------------------------------------------------------------------
# Fused whole-network kernel.
# Ref order: x, [w_taps, pool, gamma, beta] * n_conv, [w, gamma, beta] * n_fc,
#            out, [row-padded activation scratch] * n_conv.
# ----------------------------------------------------------------------------
def _make_net_kernel(n, conv_cfg, fc_relu):
    n_conv = len(conv_cfg)
    n_fc = len(fc_relu)

    def kernel(*refs):
        x_ref = refs[0]
        conv_refs = refs[1:1 + 4 * n_conv]
        fc_refs = refs[1 + 4 * n_conv:1 + 4 * n_conv + 3 * n_fc]
        o_ref = refs[1 + 4 * n_conv + 3 * n_fc]
        pad_refs = refs[2 + 4 * n_conv + 3 * n_fc:]

        act = x_ref[...]                                  # (n, h0, w0*c0) f32
        for li, (h, w, cin, ho, wo, cout, stride, relu) in enumerate(conv_cfg):
            wt_ref, m_ref, g_ref, b_ref = conv_refs[4 * li:4 * li + 4]
            pad_ref = pad_refs[li]
            lanes_in = w * cin
            lanes_out = wo * cout

            # Row padding only (column padding is folded into the tap weights):
            # zero the two border rows, write the interior aligned at _PAD_TOP.
            zrow = jnp.zeros((n, 1, lanes_in), jnp.float32)
            pad_ref[:, _PAD_TOP - 1:_PAD_TOP, :] = zrow
            pad_ref[:, _PAD_TOP + h:_PAD_TOP + h + 1, :] = zrow
            pad_ref[:, _PAD_TOP:_PAD_TOP + h, :] = act

            # 3 lane-dense tap matmuls (one per kernel row), K = W*Cin.
            acc = None
            for di in range(3):
                start = _PAD_TOP - 1 + di
                if stride == 1:
                    xt = pad_ref[:, start:start + ho, :]
                else:
                    xt = pad_ref[:, pl.ds(start, ho, stride), :]
                xt = xt.reshape(n * ho, lanes_in).astype(jnp.bfloat16)
                part = jnp.dot(xt, wt_ref[di],
                               preferred_element_type=jnp.float32)
                acc = part if acc is None else acc + part

            # BatchNorm2d (batch statistics, biased variance): per-(w,c) lane
            # sums are pooled over w and broadcast back per channel with a 0/1
            # matmul so the reduction never leaves the lane-dense layout.
            inv_cnt = 1.0 / float(n * ho * wo)
            s1 = jnp.sum(acc, axis=0, keepdims=True)
            s2 = jnp.sum(acc * acc, axis=0, keepdims=True)
            mean_l = jnp.dot(s1, m_ref[...],
                             preferred_element_type=jnp.float32) * inv_cnt
            ex2_l = jnp.dot(s2, m_ref[...],
                            preferred_element_type=jnp.float32) * inv_cnt
            var_l = jnp.maximum(ex2_l - mean_l * mean_l, 0.0)
            y = (acc - mean_l) * jax.lax.rsqrt(var_l + BN_EPS)
            y = y * g_ref[...] + b_ref[...]
            if relu:
                y = jnp.maximum(y, 0.0)
            act = y.reshape(n, ho, lanes_out)             # next layer / FC

        # ---- FC stack.  The NCHW-flatten permutation and the flatten itself
        # are folded into the first FC weight (shape (H_last, W*C, Fout)), so
        # the conv->FC hand-off is H_last small matmuls, no in-kernel reshape.
        h_act = act                                       # (n, ho_last, P) f32
        for fi, relu in enumerate(fc_relu):
            w_ref, g_ref, b_ref = fc_refs[3 * fi:3 * fi + 3]
            if fi == 0:
                rows = h_act.shape[1]
                y = None
                for r in range(rows):
                    part = jnp.dot(h_act[:, r, :].astype(jnp.bfloat16),
                                   w_ref[r],
                                   preferred_element_type=jnp.float32)
                    y = part if y is None else y + part
            else:
                y = jnp.dot(h_act.astype(jnp.bfloat16), w_ref[...],
                            preferred_element_type=jnp.float32)
            # BatchNorm1d (batch statistics, biased variance), f32 math.
            mean = jnp.mean(y, axis=0, keepdims=True)
            var = jnp.maximum(
                jnp.mean(y * y, axis=0, keepdims=True) - mean * mean, 0.0)
            y = (y - mean) * jax.lax.rsqrt(var + BN_EPS)
            y = y * g_ref[...] + b_ref[...]
            if relu:
                y = jnp.maximum(y, 0.0)
            h_act = y

        o_ref[...] = h_act.astype(o_ref.dtype)

    return kernel


# ----------------------------------------------------------------------------
# Full ConvMSANet forward (single pallas_call).
# ----------------------------------------------------------------------------
def conv_msa_net_forward(x_nchw, conv_layers, fc_layers, num_classes):
    n, c0, h0, w0 = x_nchw.shape
    # NCHW -> (N, H, W*C) channel-interleaved lane layout (tiny one-time op).
    x_in = jnp.transpose(x_nchw, (0, 2, 3, 1)).reshape(n, h0, w0 * c0)

    conv_cfg = tuple((l["h"], l["w"], l["cin"], l["ho"], l["wo"], l["cout"],
                      l["stride"], l["relu"]) for l in conv_layers)
    assert conv_cfg[0][:3] == (h0, w0, c0)
    fc_relu = tuple(l["relu"] for l in fc_layers)

    args = [x_in]
    in_specs = [_full_spec(x_in)]
    for l in conv_layers:
        for name in ("w_taps", "pool", "gamma", "beta"):
            args.append(l[name])
            in_specs.append(_full_spec(l[name]))
    for l in fc_layers:
        for name in ("w", "gamma", "beta"):
            args.append(l[name])
            in_specs.append(_full_spec(l[name]))

    f_last = fc_layers[-1]["w"].shape[-1]
    # Row-padded, lane-dense (N, rows, W*Cin) activation scratch per conv layer.
    scratch_shapes = [
        pltpu.VMEM((n, l["h"] + _PAD_TOP + 2, l["w"] * l["cin"]), jnp.float32)
        for l in conv_layers
    ]

    out = pl.pallas_call(
        _make_net_kernel(n, conv_cfg, fc_relu),
        out_shape=jax.ShapeDtypeStruct((n, f_last), jnp.float32),
        grid=(1,),
        in_specs=in_specs,
        out_specs=pl.BlockSpec((n, f_last), lambda i: (0, 0)),
        scratch_shapes=scratch_shapes,
        compiler_params=pltpu.CompilerParams(
            dimension_semantics=("arbitrary",),
            # Everything (weights + activations + scratch) is < 2 MiB here, so
            # 32 MiB is comfortably within the scoped limit on v5e/v6e/v7x.
            # TODO(synk): once sum(bf16 weights) approaches this, tile the FC
            # weights over K/N instead of keeping them fully resident.
            vmem_limit_bytes=32 * 1024 * 1024),
    )(*args)
    return out[:, :num_classes]            # drop lane-padding logit columns


# ----------------------------------------------------------------------------
# Deterministic parameter construction in the kernel's fused layouts.
# Real PyTorch weights ((cout,cin,kh,kw) conv, (fout,fin) linear) would be
# permuted/transposed into the same layouts; here we draw them directly.
# ----------------------------------------------------------------------------
def build_params(key, num_channels, subsample_points, sizes_fc, in_hw):
    h, w = in_hw
    n_conv = len(num_channels) - 1
    conv_layers = []
    for i in range(n_conv):
        cin, cout = num_channels[i], num_channels[i + 1]
        stride = 2 if i in subsample_points else 1
        ho = (h + 2 - 3) // stride + 1
        wo = (w + 2 - 3) // stride + 1
        key, wk = jax.random.split(key)
        w_k = np.asarray(jax.random.normal(wk, (3, 3, cin, cout), jnp.float32)
                         * (2.0 / (9 * cin)) ** 0.5)       # (kh, kw, cin, cout)
        # Fold the kw taps and the width zero-padding (padding=1) into three
        # block-structured tap weights of shape (W*Cin, Wo*Cout).
        taps = np.zeros((3, w * cin, wo * cout), np.float32)
        for di in range(3):
            for dj in range(3):
                for jo in range(wo):
                    j = stride * jo + dj - 1
                    if 0 <= j < w:
                        taps[di, j * cin:(j + 1) * cin,
                             jo * cout:(jo + 1) * cout] += w_k[di, dj]
        # 0/1 channel-pooling matrix: maps per-(w,c) lane sums to per-channel
        # sums broadcast back to every (w',c) lane.
        lane_c = np.arange(wo * cout) % cout
        pool = (lane_c[:, None] == lane_c[None, :]).astype(np.float32)
        gamma_l = np.tile(np.ones((cout,), np.float32), wo)[None, :]
        beta_l = np.zeros((1, wo * cout), np.float32)
        conv_layers.append(dict(
            w_taps=jnp.asarray(taps, jnp.bfloat16),
            pool=jnp.asarray(pool),
            gamma=jnp.asarray(gamma_l),
            beta=jnp.asarray(beta_l),
            h=h, w=w, cin=cin, cout=cout, ho=ho, wo=wo,
            stride=stride, relu=(i < n_conv - 1)))
        h, w = ho, wo

    c_last = num_channels[-1]
    assert sizes_fc[0] == c_last * h * w
    p_last = w * c_last                       # conv-output lane width (W*C)

    fc_layers = []
    n_fc = len(sizes_fc) - 1
    for i in range(n_fc):
        fin, fout = sizes_fc[i], sizes_fc[i + 1]
        fout_pad = _round_up(fout, 128)
        key, wk = jax.random.split(key)
        wmat = np.asarray(jax.random.normal(wk, (fin, fout), jnp.float32)
                          * (1.0 / fin) ** 0.5)
        if i == 0:
            # PyTorch flattens NCHW as (c, h, w); our conv output flattens as
            # (h, (w, c)).  Fold that permutation into the weight rows and
            # store the weight as (H_last, W*C, Fout) so the kernel's conv->FC
            # hand-off needs no reshape of the activations.
            hh, ww, cc = np.meshgrid(np.arange(h), np.arange(w),
                                     np.arange(c_last), indexing="ij")
            chw_index = (cc * (h * w) + hh * w + ww).reshape(-1)
            wmat = wmat[chw_index, :]
            wmat = np.pad(wmat, ((0, 0), (0, fout_pad - fout)))
            wmat = wmat.reshape(h, p_last, fout_pad)
        else:
            fin_pad = _round_up(fin, 128)
            wmat = np.pad(wmat, ((0, fin_pad - fin), (0, fout_pad - fout)))
        # gamma is zero-padded so padded lanes stay exactly 0 through BN/ReLU.
        gamma = np.pad(np.ones((fout,), np.float32),
                       (0, fout_pad - fout))[None, :]
        beta = np.zeros((1, fout_pad), np.float32)
        fc_layers.append(dict(w=jnp.asarray(wmat, jnp.bfloat16),
                              gamma=jnp.asarray(gamma),
                              beta=jnp.asarray(beta),
                              relu=(i < n_fc - 1)))
    return conv_layers, fc_layers


if __name__ == "__main__":
    # ConvMSANet(num_conv=2, num_channels=[4, 8, 16], subsample_points=[1],
    #            num_fc=2, sizes_fc=[16*8*8, 32, 10], batchnorm=True)
    key = jax.random.PRNGKey(0)
    key, xkey = jax.random.split(key)

    batch, cin, hw = 2, 4, 16
    num_channels = [4, 8, 16]
    subsample_points = [1]          # second conv uses stride 2: 16x16 -> 8x8
    num_classes = 10

    h = hw
    for i in range(len(num_channels) - 1):
        s = 2 if i in subsample_points else 1
        h = (h + 2 - 3) // s + 1
    sizes_fc = [num_channels[-1] * h * h, 32, num_classes]

    x = jax.random.normal(xkey, (batch, cin, hw, hw), dtype=jnp.float32)  # NCHW
    conv_layers, fc_layers = build_params(
        key, num_channels, subsample_points, sizes_fc, (hw, hw))

    fwd = jax.jit(functools.partial(
        conv_msa_net_forward, conv_layers=conv_layers, fc_layers=fc_layers,
        num_classes=num_classes))
    out = fwd(x)
    jax.block_until_ready(out)
    assert out.shape == (batch, num_classes), out.shape
    assert bool(jnp.all(jnp.isfinite(out))), "non-finite output"
    print("KERNEL_OK")
</pallas_src>

<mosaic_0001>
module attributes {stable_mosaic.version = 11 : i64} {
  func.func @kernel(%arg0: i32, %arg1: memref<2x16x64xf32, #tpu.memory_space<vmem>>, %arg2: memref<3x64x128xbf16, #tpu.memory_space<vmem>>, %arg3: memref<128x128xf32, #tpu.memory_space<vmem>>, %arg4: memref<1x128xf32, #tpu.memory_space<vmem>>, %arg5: memref<1x128xf32, #tpu.memory_space<vmem>>, %arg6: memref<3x128x128xbf16, #tpu.memory_space<vmem>>, %arg7: memref<128x128xf32, #tpu.memory_space<vmem>>, %arg8: memref<1x128xf32, #tpu.memory_space<vmem>>, %arg9: memref<1x128xf32, #tpu.memory_space<vmem>>, %arg10: memref<8x128x128xbf16, #tpu.memory_space<vmem>>, %arg11: memref<1x128xf32, #tpu.memory_space<vmem>>, %arg12: memref<1x128xf32, #tpu.memory_space<vmem>>, %arg13: memref<128x128xbf16, #tpu.memory_space<vmem>>, %arg14: memref<1x128xf32, #tpu.memory_space<vmem>>, %arg15: memref<1x128xf32, #tpu.memory_space<vmem>>, %arg16: memref<2x128xf32, #tpu.memory_space<vmem>>, %arg17: memref<2x26x64xf32, #tpu.memory_space<vmem>>, %arg18: memref<2x26x128xf32, #tpu.memory_space<vmem>>) attributes {dimension_semantics = [#tpu.dimension_semantics<arbitrary>], iteration_bounds = array<i64: 1>, scalar_prefetch = 0 : i64, scratch_operands = 2 : i64, tpu.core_type = #tpu.core_type<tc>, window_params = [{pipeline_mode = #tpu.pipeline_mode<synchronous>, transform_indices = @transform_0, window_bounds = array<i64: 2, 16, 64>}, {pipeline_mode = #tpu.pipeline_mode<synchronous>, transform_indices = @transform_1, window_bounds = array<i64: 3, 64, 128>}, {pipeline_mode = #tpu.pipeline_mode<synchronous>, transform_indices = @transform_2, window_bounds = array<i64: 128, 128>}, {pipeline_mode = #tpu.pipeline_mode<synchronous>, transform_indices = @transform_3, window_bounds = array<i64: 1, 128>}, {pipeline_mode = #tpu.pipeline_mode<synchronous>, transform_indices = @transform_4, window_bounds = array<i64: 1, 128>}, {pipeline_mode = #tpu.pipeline_mode<synchronous>, transform_indices = @transform_5, window_bounds = array<i64: 3, 128, 128>}, {pipeline_mode = #tpu.pipeline_mode<synchronous>, transform_indices = @transform_6, window_bounds = array<i64: 128, 128>}, {pipeline_mode = #tpu.pipeline_mode<synchronous>, transform_indices = @transform_7, window_bounds = array<i64: 1, 128>}, {pipeline_mode = #tpu.pipeline_mode<synchronous>, transform_indices = @transform_8, window_bounds = array<i64: 1, 128>}, {pipeline_mode = #tpu.pipeline_mode<synchronous>, transform_indices = @transform_9, window_bounds = array<i64: 8, 128, 128>}, {pipeline_mode = #tpu.pipeline_mode<synchronous>, transform_indices = @transform_10, window_bounds = array<i64: 1, 128>}, {pipeline_mode = #tpu.pipeline_mode<synchronous>, transform_indices = @transform_11, window_bounds = array<i64: 1, 128>}, {pipeline_mode = #tpu.pipeline_mode<synchronous>, transform_indices = @transform_12, window_bounds = array<i64: 128, 128>}, {pipeline_mode = #tpu.pipeline_mode<synchronous>, transform_indices = @transform_13, window_bounds = array<i64: 1, 128>}, {pipeline_mode = #tpu.pipeline_mode<synchronous>, transform_indices = @transform_14, window_bounds = array<i64: 1, 128>}, {pipeline_mode = #tpu.pipeline_mode<synchronous>, transform_indices = @transform_15, window_bounds = array<i64: 2, 128>}]} {
    %c0 = arith.constant 0 : index
    %c0_0 = arith.constant 0 : index
    %c0_1 = arith.constant 0 : index
    %0 = vector.load %arg1[%c0, %c0_0, %c0_1] : memref<2x16x64xf32, #tpu.memory_space<vmem>>, vector<2x16x64xf32>
    %cst = arith.constant 0.000000e+00 : f32
    %1 = vector.broadcast %cst : f32 to vector<2x1x64xf32>
    %c0_2 = arith.constant 0 : index
    %c7 = arith.constant 7 : index
    %c0_3 = arith.constant 0 : index
    %2 = vector.load %arg17[%c0_2, %c7, %c0_3] : memref<2x26x64xf32, #tpu.memory_space<vmem>>, vector<2x1x64xf32>
    tpu.vector_store %arg17[%c0_2, %c7, %c0_3], %1 {strides = array<i32>} : memref<2x26x64xf32, #tpu.memory_space<vmem>>, vector<2x1x64xf32>,
    %c0_4 = arith.constant 0 : index
    %c24 = arith.constant 24 : index
    %c0_5 = arith.constant 0 : index
    %3 = vector.load %arg17[%c0_4, %c24, %c0_5] : memref<2x26x64xf32, #tpu.memory_space<vmem>>, vector<2x1x64xf32>
    tpu.vector_store %arg17[%c0_4, %c24, %c0_5], %1 {strides = array<i32>} : memref<2x26x64xf32, #tpu.memory_space<vmem>>, vector<2x1x64xf32>,
    %c0_6 = arith.constant 0 : index
    %c8 = arith.constant 8 : index
    %c0_7 = arith.constant 0 : index
    %4 = vector.load %arg17[%c0_6, %c8, %c0_7] : memref<2x26x64xf32, #tpu.memory_space<vmem>>, vector<2x16x64xf32>
    tpu.vector_store %arg17[%c0_6, %c8, %c0_7], %0 {strides = array<i32>} : memref<2x26x64xf32, #tpu.memory_space<vmem>>, vector<2x16x64xf32>,
    %c0_8 = arith.constant 0 : index
    %c7_9 = arith.constant 7 : index
    %c0_10 = arith.constant 0 : index
    %5 = vector.load %arg17[%c0_8, %c7_9, %c0_10] : memref<2x26x64xf32, #tpu.memory_space<vmem>>, vector<2x16x64xf32>
    %6 = vector.shape_cast %5 : vector<2x16x64xf32> to vector<32x64xf32>
    %7 = arith.truncf %6 : vector<32x64xf32> to vector<32x64xbf16>
    %c0_11 = arith.constant 0 : index
    %c0_12 = arith.constant 0 : index
    %c0_13 = arith.constant 0 : index
    %8 = vector.load %arg2[%c0_11, %c0_12, %c0_13] : memref<3x64x128xbf16, #tpu.memory_space<vmem>>, vector<1x64x128xbf16>
    %9 = vector.shape_cast %8 : vector<1x64x128xbf16> to vector<64x128xbf16>
    %cst_14 = arith.constant dense<0.000000e+00> : vector<32x128xf32>
    %10 = tpu.matmul %7, %9, %cst_14 {dimension_numbers = #tpu.dot_dimension_numbers<[1], [0], [0], [1], [0, 0, 1, 1], [], []>} : vector<32x64xbf16>, vector<64x128xbf16>, vector<32x128xf32> -> vector<32x128xf32>
    %c0_15 = arith.constant 0 : index
    %c8_16 = arith.constant 8 : index
    %c0_17 = arith.constant 0 : index
    %11 = vector.load %arg17[%c0_15, %c8_16, %c0_17] : memref<2x26x64xf32, #tpu.memory_space<vmem>>, vector<2x16x64xf32>
    %12 = vector.shape_cast %11 : vector<2x16x64xf32> to vector<32x64xf32>
    %13 = arith.truncf %12 : vector<32x64xf32> to vector<32x64xbf16>
    %c1 = arith.constant 1 : index
    %c0_18 = arith.constant 0 : index
    %c0_19 = arith.constant 0 : index
    %14 = vector.load %arg2[%c1, %c0_18, %c0_19] : memref<3x64x128xbf16, #tpu.memory_space<vmem>>, vector<1x64x128xbf16>
    %15 = vector.shape_cast %14 : vector<1x64x128xbf16> to vector<64x128xbf16>
    %cst_20 = arith.constant dense<0.000000e+00> : vector<32x128xf32>
    %16 = tpu.matmul %13, %15, %cst_20 {dimension_numbers = #tpu.dot_dimension_numbers<[1], [0], [0], [1], [0, 0, 1, 1], [], []>} : vector<32x64xbf16>, vector<64x128xbf16>, vector<32x128xf32> -> vector<32x128xf32>
    %17 = arith.addf %10, %16 : vector<32x128xf32>
    %c0_21 = arith.constant 0 : index
    %c9 = arith.constant 9 : index
    %c0_22 = arith.constant 0 : index
    %18 = vector.load %arg17[%c0_21, %c9, %c0_22] : memref<2x26x64xf32, #tpu.memory_space<vmem>>, vector<2x16x64xf32>
    %19 = vector.shape_cast %18 : vector<2x16x64xf32> to vector<32x64xf32>
    %20 = arith.truncf %19 : vector<32x64xf32> to vector<32x64xbf16>
    %c2 = arith.constant 2 : index
    %c0_23 = arith.constant 0 : index
    %c0_24 = arith.constant 0 : index
    %21 = vector.load %arg2[%c2, %c0_23, %c0_24] : memref<3x64x128xbf16, #tpu.memory_space<vmem>>, vector<1x64x128xbf16>
    %22 = vector.shape_cast %21 : vector<1x64x128xbf16> to vector<64x128xbf16>
    %cst_25 = arith.constant dense<0.000000e+00> : vector<32x128xf32>
    %23 = tpu.matmul %20, %22, %cst_25 {dimension_numbers = #tpu.dot_dimension_numbers<[1], [0], [0], [1], [0, 0, 1, 1], [], []>} : vector<32x64xbf16>, vector<64x128xbf16>, vector<32x128xf32> -> vector<32x128xf32>
    %24 = arith.addf %17, %23 : vector<32x128xf32>
    %cst_26 = arith.constant dense<0.000000e+00> : vector<128xf32>
    %25 = vector.multi_reduction <add>, %24, %cst_26 [0] : vector<32x128xf32> to vector<128xf32>
    %26 = vector.shape_cast %25 : vector<128xf32> to vector<1x128xf32>
    %27 = arith.mulf %24, %24 : vector<32x128xf32>
    %cst_27 = arith.constant dense<0.000000e+00> : vector<128xf32>
    %28 = vector.multi_reduction <add>, %27, %cst_27 [0] : vector<32x128xf32> to vector<128xf32>
    %29 = vector.shape_cast %28 : vector<128xf32> to vector<1x128xf32>
    %c0_28 = arith.constant 0 : index
    %c0_29 = arith.constant 0 : index
    %30 = vector.load %arg3[%c0_28, %c0_29] : memref<128x128xf32, #tpu.memory_space<vmem>>, vector<128x128xf32>
    %cst_30 = arith.constant dense<0.000000e+00> : vector<1x128xf32>
    %31 = tpu.matmul %26, %30, %cst_30 {dimension_numbers = #tpu.dot_dimension_numbers<[1], [0], [0], [1], [0, 0, 1, 1], [], []>} : vector<1x128xf32>, vector<128x128xf32>, vector<1x128xf32> -> vector<1x128xf32>
    %cst_31 = arith.constant 0.001953125 : f32
    %32 = vector.broadcast %cst_31 : f32 to vector<1x128xf32>
    %33 = arith.mulf %31, %32 : vector<1x128xf32>
    %c0_32 = arith.constant 0 : index
    %c0_33 = arith.constant 0 : index
    %34 = vector.load %arg3[%c0_32, %c0_33] : memref<128x128xf32, #tpu.memory_space<vmem>>, vector<128x128xf32>
    %cst_34 = arith.constant dense<0.000000e+00> : vector<1x128xf32>
    %35 = tpu.matmul %29, %34, %cst_34 {dimension_numbers = #tpu.dot_dimension_numbers<[1], [0], [0], [1], [0, 0, 1, 1], [], []>} : vector<1x128xf32>, vector<128x128xf32>, vector<1x128xf32> -> vector<1x128xf32>
    %cst_35 = arith.constant 0.001953125 : f32
    %36 = vector.broadcast %cst_35 : f32 to vector<1x128xf32>
    %37 = arith.mulf %35, %36 : vector<1x128xf32>
    %38 = arith.mulf %33, %33 : vector<1x128xf32>
    %39 = arith.subf %37, %38 : vector<1x128xf32>
    %cst_36 = arith.constant 0.000000e+00 : f32
    %40 = vector.broadcast %cst_36 : f32 to vector<1x128xf32>
    %41 = arith.maximumf %39, %40 : vector<1x128xf32>
    %42 = vector.broadcast %33 : vector<1x128xf32> to vector<32x128xf32>
    %43 = arith.subf %24, %42 : vector<32x128xf32>
    %cst_37 = arith.constant 9.99999974E-6 : f32
    %44 = vector.broadcast %cst_37 : f32 to vector<1x128xf32>
    %45 = arith.addf %41, %44 : vector<1x128xf32>
    %46 = math.rsqrt %45 : vector<1x128xf32>
    %47 = vector.broadcast %46 : vector<1x128xf32> to vector<32x128xf32>
    %48 = arith.mulf %43, %47 : vector<32x128xf32>
    %c0_38 = arith.constant 0 : index
    %c0_39 = arith.constant 0 : index
    %49 = vector.load %arg4[%c0_38, %c0_39] : memref<1x128xf32, #tpu.memory_space<vmem>>, vector<1x128xf32>
    %50 = vector.broadcast %49 : vector<1x128xf32> to vector<32x128xf32>
    %51 = arith.mulf %48, %50 : vector<32x128xf32>
    %c0_40 = arith.constant 0 : index
    %c0_41 = arith.constant 0 : index
    %52 = vector.load %arg5[%c0_40, %c0_41] : memref<1x128xf32, #tpu.memory_space<vmem>>, vector<1x128xf32>
    %53 = vector.broadcast %52 : vector<1x128xf32> to vector<32x128xf32>
    %54 = arith.addf %51, %53 : vector<32x128xf32>
    %cst_42 = arith.constant 0.000000e+00 : f32
    %55 = vector.broadcast %cst_42 : f32 to vector<32x128xf32>
    %56 = arith.maximumf %54, %55 : vector<32x128xf32>
    %57 = vector.shape_cast %56 : vector<32x128xf32> to vector<2x16x128xf32>
    %cst_43 = arith.constant 0.000000e+00 : f32
    %58 = vector.broadcast %cst_43 : f32 to vector<2x1x128xf32>
    %c0_44 = arith.constant 0 : index
    %c7_45 = arith.constant 7 : index
    %c0_46 = arith.constant 0 : index
    %59 = vector.load %arg18[%c0_44, %c7_45, %c0_46] : memref<2x26x128xf32, #tpu.memory_space<vmem>>, vector<2x1x128xf32>
    tpu.vector_store %arg18[%c0_44, %c7_45, %c0_46], %58 {strides = array<i32>} : memref<2x26x128xf32, #tpu.memory_space<vmem>>, vector<2x1x128xf32>,
    %c0_47 = arith.constant 0 : index
    %c24_48 = arith.constant 24 : index
    %c0_49 = arith.constant 0 : index
    %60 = vector.load %arg18[%c0_47, %c24_48, %c0_49] : memref<2x26x128xf32, #tpu.memory_space<vmem>>, vector<2x1x128xf32>
    tpu.vector_store %arg18[%c0_47, %c24_48, %c0_49], %58 {strides = array<i32>} : memref<2x26x128xf32, #tpu.memory_space<vmem>>, vector<2x1x128xf32>,
    %c0_50 = arith.constant 0 : index
    %c8_51 = arith.constant 8 : index
    %c0_52 = arith.constant 0 : index
    %61 = vector.load %arg18[%c0_50, %c8_51, %c0_52] : memref<2x26x128xf32, #tpu.memory_space<vmem>>, vector<2x16x128xf32>
    tpu.vector_store %arg18[%c0_50, %c8_51, %c0_52], %57 {strides = array<i32>} : memref<2x26x128xf32, #tpu.memory_space<vmem>>, vector<2x16x128xf32>,
    %c0_53 = arith.constant 0 : index
    %c7_54 = arith.constant 7 : index
    %c0_55 = arith.constant 0 : index
    %62 = tpu.strided_load %arg18[%c0_53, %c7_54, %c0_55] {strides = array<i32: 1, 2, 1>} : memref<2x26x128xf32, #tpu.memory_space<vmem>>, vector<2x8x128xf32>
    %63 = vector.shape_cast %62 : vector<2x8x128xf32> to vector<16x128xf32>
    %64 = arith.truncf %63 : vector<16x128xf32> to vector<16x128xbf16>
    %c0_56 = arith.constant 0 : index
    %c0_57 = arith.constant 0 : index
    %c0_58 = arith.constant 0 : index
    %65 = vector.load %arg6[%c0_56, %c0_57, %c0_58] : memref<3x128x128xbf16, #tpu.memory_space<vmem>>, vector<1x128x128xbf16>
    %66 = vector.shape_cast %65 : vector<1x128x128xbf16> to vector<128x128xbf16>
    %cst_59 = arith.constant dense<0.000000e+00> : vector<16x128xf32>
    %67 = tpu.matmul %64, %66, %cst_59 {dimension_numbers = #tpu.dot_dimension_numbers<[1], [0], [0], [1], [0, 0, 1, 1], [], []>} : vector<16x128xbf16>, vector<128x128xbf16>, vector<16x128xf32> -> vector<16x128xf32>
    %c0_60 = arith.constant 0 : index
    %c8_61 = arith.constant 8 : index
    %c0_62 = arith.constant 0 : index
    %68 = tpu.strided_load %arg18[%c0_60, %c8_61, %c0_62] {strides = array<i32: 1, 2, 1>} : memref<2x26x128xf32, #tpu.memory_space<vmem>>, vector<2x8x128xf32>
    %69 = vector.shape_cast %68 : vector<2x8x128xf32> to vector<16x128xf32>
    %70 = arith.truncf %69 : vector<16x128xf32> to vector<16x128xbf16>
    %c1_63 = arith.constant 1 : index
    %c0_64 = arith.constant 0 : index
    %c0_65 = arith.constant 0 : index
    %71 = vector.load %arg6[%c1_63, %c0_64, %c0_65] : memref<3x128x128xbf16, #tpu.memory_space<vmem>>, vector<1x128x128xbf16>
    %72 = vector.shape_cast %71 : vector<1x128x128xbf16> to vector<128x128xbf16>
    %cst_66 = arith.constant dense<0.000000e+00> : vector<16x128xf32>
    %73 = tpu.matmul %70, %72, %cst_66 {dimension_numbers = #tpu.dot_dimension_numbers<[1], [0], [0], [1], [0, 0, 1, 1], [], []>} : vector<16x128xbf16>, vector<128x128xbf16>, vector<16x128xf32> -> vector<16x128xf32>
    %74 = arith.addf %67, %73 : vector<16x128xf32>
    %c0_67 = arith.constant 0 : index
    %c9_68 = arith.constant 9 : index
    %c0_69 = arith.constant 0 : index
    %75 = tpu.strided_load %arg18[%c0_67, %c9_68, %c0_69] {strides = array<i32: 1, 2, 1>} : memref<2x26x128xf32, #tpu.memory_space<vmem>>, vector<2x8x128xf32>
    %76 = vector.shape_cast %75 : vector<2x8x128xf32> to vector<16x128xf32>
    %77 = arith.truncf %76 : vector<16x128xf32> to vector<16x128xbf16>
    %c2_70 = arith.constant 2 : index
    %c0_71 = arith.constant 0 : index
    %c0_72 = arith.constant 0 : index
    %78 = vector.load %arg6[%c2_70, %c0_71, %c0_72] : memref<3x128x128xbf16, #tpu.memory_space<vmem>>, vector<1x128x128xbf16>
    %79 = vector.shape_cast %78 : vector<1x128x128xbf16> to vector<128x128xbf16>
    %cst_73 = arith.constant dense<0.000000e+00> : vector<16x128xf32>
    %80 = tpu.matmul %77, %79, %cst_73 {dimension_numbers = #tpu.dot_dimension_numbers<[1], [0], [0], [1], [0, 0, 1, 1], [], []>} : vector<16x128xbf16>, vector<128x128xbf16>, vector<16x128xf32> -> vector<16x128xf32>
    %81 = arith.addf %74, %80 : vector<16x128xf32>
    %cst_74 = arith.constant dense<0.000000e+00> : vector<128xf32>
    %82 = vector.multi_reduction <add>, %81, %cst_74 [0] : vector<16x128xf32> to vector<128xf32>
    %83 = vector.shape_cast %82 : vector<128xf32> to vector<1x128xf32>
    %84 = arith.mulf %81, %81 : vector<16x128xf32>
    %cst_75 = arith.constant dense<0.000000e+00> : vector<128xf32>
    %85 = vector.multi_reduction <add>, %84, %cst_75 [0] : vector<16x128xf32> to vector<128xf32>
    %86 = vector.shape_cast %85 : vector<128xf32> to vector<1x128xf32>
    %c0_76 = arith.constant 0 : index
    %c0_77 = arith.constant 0 : index
    %87 = vector.load %arg7[%c0_76, %c0_77] : memref<128x128xf32, #tpu.memory_space<vmem>>, vector<128x128xf32>
    %cst_78 = arith.constant dense<0.000000e+00> : vector<1x128xf32>
    %88 = tpu.matmul %83, %87, %cst_78 {dimension_numbers = #tpu.dot_dimension_numbers<[1], [0], [0], [1], [0, 0, 1, 1], [], []>} : vector<1x128xf32>, vector<128x128xf32>, vector<1x128xf32> -> vector<1x128xf32>
    %cst_79 = arith.constant 7.812500e-03 : f32
    %89 = vector.broadcast %cst_79 : f32 to vector<1x128xf32>
    %90 = arith.mulf %88, %89 : vector<1x128xf32>
    %c0_80 = arith.constant 0 : index
    %c0_81 = arith.constant 0 : index
    %91 = vector.load %arg7[%c0_80, %c0_81] : memref<128x128xf32, #tpu.memory_space<vmem>>, vector<128x128xf32>
    %cst_82 = arith.constant dense<0.000000e+00> : vector<1x128xf32>
    %92 = tpu.matmul %86, %91, %cst_82 {dimension_numbers = #tpu.dot_dimension_numbers<[1], [0], [0], [1], [0, 0, 1, 1], [], []>} : vector<1x128xf32>, vector<128x128xf32>, vector<1x128xf32> -> vector<1x128xf32>
    %cst_83 = arith.constant 7.812500e-03 : f32
    %93 = vector.broadcast %cst_83 : f32 to vector<1x128xf32>
    %94 = arith.mulf %92, %93 : vector<1x128xf32>
    %95 = arith.mulf %90, %90 : vector<1x128xf32>
    %96 = arith.subf %94, %95 : vector<1x128xf32>
    %cst_84 = arith.constant 0.000000e+00 : f32
    %97 = vector.broadcast %cst_84 : f32 to vector<1x128xf32>
    %98 = arith.maximumf %96, %97 : vector<1x128xf32>
    %99 = vector.broadcast %90 : vector<1x128xf32> to vector<16x128xf32>
    %100 = arith.subf %81, %99 : vector<16x128xf32>
    %cst_85 = arith.constant 9.99999974E-6 : f32
    %101 = vector.broadcast %cst_85 : f32 to vector<1x128xf32>
    %102 = arith.addf %98, %101 : vector<1x128xf32>
    %103 = math.rsqrt %102 : vector<1x128xf32>
    %104 = vector.broadcast %103 : vector<1x128xf32> to vector<16x128xf32>
    %105 = arith.mulf %100, %104 : vector<16x128xf32>
    %c0_86 = arith.constant 0 : index
    %c0_87 = arith.constant 0 : index
    %106 = vector.load %arg8[%c0_86, %c0_87] : memref<1x128xf32, #tpu.memory_space<vmem>>, vector<1x128xf32>
    %107 = vector.broadcast %106 : vector<1x128xf32> to vector<16x128xf32>
    %108 = arith.mulf %105, %107 : vector<16x128xf32>
    %c0_88 = arith.constant 0 : index
    %c0_89 = arith.constant 0 : index
    %109 = vector.load %arg9[%c0_88, %c0_89] : memref<1x128xf32, #tpu.memory_space<vmem>>, vector<1x128xf32>
    %110 = vector.broadcast %109 : vector<1x128xf32> to vector<16x128xf32>
    %111 = arith.addf %108, %110 : vector<16x128xf32>
    %112 = vector.shape_cast %111 : vector<16x128xf32> to vector<2x8x128xf32>
    %113 = vector.extract_strided_slice %112 {offsets = [0, 0, 0], sizes = [2, 1, 128], strides = [1, 1, 1]} : vector<2x8x128xf32> to vector<2x1x128xf32>
    %114 = vector.shape_cast %113 : vector<2x1x128xf32> to vector<2x128xf32>
    %115 = arith.truncf %114 : vector<2x128xf32> to vector<2x128xbf16>
    %c0_90 = arith.constant 0 : index
    %c0_91 = arith.constant 0 : index
    %c0_92 = arith.constant 0 : index
    %116 = vector.load %arg10[%c0_90, %c0_91, %c0_92] : memref<8x128x128xbf16, #tpu.memory_space<vmem>>, vector<1x128x128xbf16>
    %117 = vector.shape_cast %116 : vector<1x128x128xbf16> to vector<128x128xbf16>
    %cst_93 = arith.constant dense<0.000000e+00> : vector<2x128xf32>
    %118 = tpu.matmul %115, %117, %cst_93 {dimension_numbers = #tpu.dot_dimension_numbers<[1], [0], [0], [1], [0, 0, 1, 1], [], []>} : vector<2x128xbf16>, vector<128x128xbf16>, vector<2x128xf32> -> vector<2x128xf32>
    %119 = vector.extract_strided_slice %112 {offsets = [0, 1, 0], sizes = [2, 1, 128], strides = [1, 1, 1]} : vector<2x8x128xf32> to vector<2x1x128xf32>
    %120 = vector.shape_cast %119 : vector<2x1x128xf32> to vector<2x128xf32>
    %121 = arith.truncf %120 : vector<2x128xf32> to vector<2x128xbf16>
    %c1_94 = arith.constant 1 : index
    %c0_95 = arith.constant 0 : index
    %c0_96 = arith.constant 0 : index
    %122 = vector.load %arg10[%c1_94, %c0_95, %c0_96] : memref<8x128x128xbf16, #tpu.memory_space<vmem>>, vector<1x128x128xbf16>
    %123 = vector.shape_cast %122 : vector<1x128x128xbf16> to vector<128x128xbf16>
    %cst_97 = arith.constant dense<0.000000e+00> : vector<2x128xf32>
    %124 = tpu.matmul %121, %123, %cst_97 {dimension_numbers = #tpu.dot_dimension_numbers<[1], [0], [0], [1], [0, 0, 1, 1], [], []>} : vector<2x128xbf16>, vector<128x128xbf16>, vector<2x128xf32> -> vector<2x128xf32>
    %125 = arith.addf %118, %124 : vector<2x128xf32>
    %126 = vector.extract_strided_slice %112 {offsets = [0, 2, 0], sizes = [2, 1, 128], strides = [1, 1, 1]} : vector<2x8x128xf32> to vector<2x1x128xf32>
    %127 = vector.shape_cast %126 : vector<2x1x128xf32> to vector<2x128xf32>
    %128 = arith.truncf %127 : vector<2x128xf32> to vector<2x128xbf16>
    %c2_98 = arith.constant 2 : index
    %c0_99 = arith.constant 0 : index
    %c0_100 = arith.constant 0 : index
    %129 = vector.load %arg10[%c2_98, %c0_99, %c0_100] : memref<8x128x128xbf16, #tpu.memory_space<vmem>>, vector<1x128x128xbf16>
    %130 = vector.shape_cast %129 : vector<1x128x128xbf16> to vector<128x128xbf16>
    %cst_101 = arith.constant dense<0.000000e+00> : vector<2x128xf32>
    %131 = tpu.matmul %128, %130, %cst_101 {dimension_numbers = #tpu.dot_dimension_numbers<[1], [0], [0], [1], [0, 0, 1, 1], [], []>} : vector<2x128xbf16>, vector<128x128xbf16>, vector<2x128xf32> -> vector<2x128xf32>
    %132 = arith.addf %125, %131 : vector<2x128xf32>
    %133 = vector.extract_strided_slice %112 {offsets = [0, 3, 0], sizes = [2, 1, 128], strides = [1, 1, 1]} : vector<2x8x128xf32> to vector<2x1x128xf32>
    %134 = vector.shape_cast %133 : vector<2x1x128xf32> to vector<2x128xf32>
    %135 = arith.truncf %134 : vector<2x128xf32> to vector<2x128xbf16>
    %c3 = arith.constant 3 : index
    %c0_102 = arith.constant 0 : index
    %c0_103 = arith.constant 0 : index
    %136 = vector.load %arg10[%c3, %c0_102, %c0_103] : memref<8x128x128xbf16, #tpu.memory_space<vmem>>, vector<1x128x128xbf16>
    %137 = vector.shape_cast %136 : vector<1x128x128xbf16> to vector<128x128xbf16>
    %cst_104 = arith.constant dense<0.000000e+00> : vector<2x128xf32>
    %138 = tpu.matmul %135, %137, %cst_104 {dimension_numbers = #tpu.dot_dimension_numbers<[1], [0], [0], [1], [0, 0, 1, 1], [], []>} : vector<2x128xbf16>, vector<128x128xbf16>, vector<2x128xf32> -> vector<2x128xf32>
    %139 = arith.addf %132, %138 : vector<2x128xf32>
    %140 = vector.extract_strided_slice %112 {offsets = [0, 4, 0], sizes = [2, 1, 128], strides = [1, 1, 1]} : vector<2x8x128xf32> to vector<2x1x128xf32>
    %141 = vector.shape_cast %140 : vector<2x1x128xf32> to vector<2x128xf32>
    %142 = arith.truncf %141 : vector<2x128xf32> to vector<2x128xbf16>
    %c4 = arith.constant 4 : index
    %c0_105 = arith.constant 0 : index
    %c0_106 = arith.constant 0 : index
    %143 = vector.load %arg10[%c4, %c0_105, %c0_106] : memref<8x128x128xbf16, #tpu.memory_space<vmem>>, vector<1x128x128xbf16>
    %144 = vector.shape_cast %143 : vector<1x128x128xbf16> to vector<128x128xbf16>
    %cst_107 = arith.constant dense<0.000000e+00> : vector<2x128xf32>
    %145 = tpu.matmul %142, %144, %cst_107 {dimension_numbers = #tpu.dot_dimension_numbers<[1], [0], [0], [1], [0, 0, 1, 1], [], []>} : vector<2x128xbf16>, vector<128x128xbf16>, vector<2x128xf32> -> vector<2x128xf32>
    %146 = arith.addf %139, %145 : vector<2x128xf32>
    %147 = vector.extract_strided_slice %112 {offsets = [0, 5, 0], sizes = [2, 1, 128], strides = [1, 1, 1]} : vector<2x8x128xf32> to vector<2x1x128xf32>
    %148 = vector.shape_cast %147 : vector<2x1x128xf32> to vector<2x128xf32>
    %149 = arith.truncf %148 : vector<2x128xf32> to vector<2x128xbf16>
    %c5 = arith.constant 5 : index
    %c0_108 = arith.constant 0 : index
    %c0_109 = arith.constant 0 : index
    %150 = vector.load %arg10[%c5, %c0_108, %c0_109] : memref<8x128x128xbf16, #tpu.memory_space<vmem>>, vector<1x128x128xbf16>
    %151 = vector.shape_cast %150 : vector<1x128x128xbf16> to vector<128x128xbf16>
    %cst_110 = arith.constant dense<0.000000e+00> : vector<2x128xf32>
    %152 = tpu.matmul %149, %151, %cst_110 {dimension_numbers = #tpu.dot_dimension_numbers<[1], [0], [0], [1], [0, 0, 1, 1], [], []>} : vector<2x128xbf16>, vector<128x128xbf16>, vector<2x128xf32> -> vector<2x128xf32>
    %153 = arith.addf %146, %152 : vector<2x128xf32>
    %154 = vector.extract_strided_slice %112 {offsets = [0, 6, 0], sizes = [2, 1, 128], strides = [1, 1, 1]} : vector<2x8x128xf32> to vector<2x1x128xf32>
    %155 = vector.shape_cast %154 : vector<2x1x128xf32> to vector<2x128xf32>
    %156 = arith.truncf %155 : vector<2x128xf32> to vector<2x128xbf16>
    %c6 = arith.constant 6 : index
    %c0_111 = arith.constant 0 : index
    %c0_112 = arith.constant 0 : index
    %157 = vector.load %arg10[%c6, %c0_111, %c0_112] : memref<8x128x128xbf16, #tpu.memory_space<vmem>>, vector<1x128x128xbf16>
    %158 = vector.shape_cast %157 : vector<1x128x128xbf16> to vector<128x128xbf16>
    %cst_113 = arith.constant dense<0.000000e+00> : vector<2x128xf32>
    %159 = tpu.matmul %156, %158, %cst_113 {dimension_numbers = #tpu.dot_dimension_numbers<[1], [0], [0], [1], [0, 0, 1, 1], [], []>} : vector<2x128xbf16>, vector<128x128xbf16>, vector<2x128xf32> -> vector<2x128xf32>
    %160 = arith.addf %153, %159 : vector<2x128xf32>
    %161 = vector.extract_strided_slice %112 {offsets = [0, 7, 0], sizes = [2, 1, 128], strides = [1, 1, 1]} : vector<2x8x128xf32> to vector<2x1x128xf32>
    %162 = vector.shape_cast %161 : vector<2x1x128xf32> to vector<2x128xf32>
    %163 = arith.truncf %162 : vector<2x128xf32> to vector<2x128xbf16>
    %c7_114 = arith.constant 7 : index
    %c0_115 = arith.constant 0 : index
    %c0_116 = arith.constant 0 : index
    %164 = vector.load %arg10[%c7_114, %c0_115, %c0_116] : memref<8x128x128xbf16, #tpu.memory_space<vmem>>, vector<1x128x128xbf16>
    %165 = vector.shape_cast %164 : vector<1x128x128xbf16> to vector<128x128xbf16>
    %cst_117 = arith.constant dense<0.000000e+00> : vector<2x128xf32>
    %166 = tpu.matmul %163, %165, %cst_117 {dimension_numbers = #tpu.dot_dimension_numbers<[1], [0], [0], [1], [0, 0, 1, 1], [], []>} : vector<2x128xbf16>, vector<128x128xbf16>, vector<2x128xf32> -> vector<2x128xf32>
    %167 = arith.addf %160, %166 : vector<2x128xf32>
    %cst_118 = arith.constant dense<0.000000e+00> : vector<128xf32>
    %168 = vector.multi_reduction <add>, %167, %cst_118 [0] : vector<2x128xf32> to vector<128xf32>
    %169 = vector.shape_cast %168 : vector<128xf32> to vector<1x128xf32>
    %cst_119 = arith.constant 2.000000e+00 : f32
    %170 = vector.broadcast %cst_119 : f32 to vector<1x128xf32>
    %171 = arith.divf %169, %170 : vector<1x128xf32>
    %172 = arith.mulf %167, %167 : vector<2x128xf32>
    %cst_120 = arith.constant dense<0.000000e+00> : vector<128xf32>
    %173 = vector.multi_reduction <add>, %172, %cst_120 [0] : vector<2x128xf32> to vector<128xf32>
    %174 = vector.shape_cast %173 : vector<128xf32> to vector<1x128xf32>
    %cst_121 = arith.constant 2.000000e+00 : f32
    %175 = vector.broadcast %cst_121 : f32 to vector<1x128xf32>
    %176 = arith.divf %174, %175 : vector<1x128xf32>
    %177 = arith.mulf %171, %171 : vector<1x128xf32>
    %178 = arith.subf %176, %177 : vector<1x128xf32>
    %cst_122 = arith.constant 0.000000e+00 : f32
    %179 = vector.broadcast %cst_122 : f32 to vector<1x128xf32>
    %180 = arith.maximumf %178, %179 : vector<1x128xf32>
    %181 = vector.broadcast %171 : vector<1x128xf32> to vector<2x128xf32>
    %182 = arith.subf %167, %181 : vector<2x128xf32>
    %cst_123 = arith.constant 9.99999974E-6 : f32
    %183 = vector.broadcast %cst_123 : f32 to vector<1x128xf32>
    %184 = arith.addf %180, %183 : vector<1x128xf32>
    %185 = math.rsqrt %184 : vector<1x128xf32>
    %186 = vector.broadcast %185 : vector<1x128xf32> to vector<2x128xf32>
    %187 = arith.mulf %182, %186 : vector<2x128xf32>
    %c0_124 = arith.constant 0 : index
    %c0_125 = arith.constant 0 : index
    %188 = vector.load %arg11[%c0_124, %c0_125] : memref<1x128xf32, #tpu.memory_space<vmem>>, vector<1x128xf32>
    %189 = vector.broadcast %188 : vector<1x128xf32> to vector<2x128xf32>
    %190 = arith.mulf %187, %189 : vector<2x128xf32>
    %c0_126 = arith.constant 0 : index
    %c0_127 = arith.constant 0 : index
    %191 = vector.load %arg12[%c0_126, %c0_127] : memref<1x128xf32, #tpu.memory_space<vmem>>, vector<1x128xf32>
    %192 = vector.broadcast %191 : vector<1x128xf32> to vector<2x128xf32>
    %193 = arith.addf %190, %192 : vector<2x128xf32>
    %cst_128 = arith.constant 0.000000e+00 : f32
    %194 = vector.broadcast %cst_128 : f32 to vector<2x128xf32>
    %195 = arith.maximumf %193, %194 : vector<2x128xf32>
    %196 = arith.truncf %195 : vector<2x128xf32> to vector<2x128xbf16>
    %c0_129 = arith.constant 0 : index
    %c0_130 = arith.constant 0 : index
    %197 = vector.load %arg13[%c0_129, %c0_130] : memref<128x128xbf16, #tpu.memory_space<vmem>>, vector<128x128xbf16>
    %cst_131 = arith.constant dense<0.000000e+00> : vector<2x128xf32>
    %198 = tpu.matmul %196, %197, %cst_131 {dimension_numbers = #tpu.dot_dimension_numbers<[1], [0], [0], [1], [0, 0, 1, 1], [], []>} : vector<2x128xbf16>, vector<128x128xbf16>, vector<2x128xf32> -> vector<2x128xf32>
    %cst_132 = arith.constant dense<0.000000e+00> : vector<128xf32>
    %199 = vector.multi_reduction <add>, %198, %cst_132 [0] : vector<2x128xf32> to vector<128xf32>
    %200 = vector.shape_cast %199 : vector<128xf32> to vector<1x128xf32>
    %cst_133 = arith.constant 2.000000e+00 : f32
    %201 = vector.broadcast %cst_133 : f32 to vector<1x128xf32>
    %202 = arith.divf %200, %201 : vector<1x128xf32>
    %203 = arith.mulf %198, %198 : vector<2x128xf32>
    %cst_134 = arith.constant dense<0.000000e+00> : vector<128xf32>
    %204 = vector.multi_reduction <add>, %203, %cst_134 [0] : vector<2x128xf32> to vector<128xf32>
    %205 = vector.shape_cast %204 : vector<128xf32> to vector<1x128xf32>
    %cst_135 = arith.constant 2.000000e+00 : f32
    %206 = vector.broadcast %cst_135 : f32 to vector<1x128xf32>
    %207 = arith.divf %205, %206 : vector<1x128xf32>
    %208 = arith.mulf %202, %202 : vector<1x128xf32>
    %209 = arith.subf %207, %208 : vector<1x128xf32>
    %cst_136 = arith.constant 0.000000e+00 : f32
    %210 = vector.broadcast %cst_136 : f32 to vector<1x128xf32>
    %211 = arith.maximumf %209, %210 : vector<1x128xf32>
    %212 = vector.broadcast %202 : vector<1x128xf32> to vector<2x128xf32>
    %213 = arith.subf %198, %212 : vector<2x128xf32>
    %cst_137 = arith.constant 9.99999974E-6 : f32
    %214 = vector.broadcast %cst_137 : f32 to vector<1x128xf32>
    %215 = arith.addf %211, %214 : vector<1x128xf32>
    %216 = math.rsqrt %215 : vector<1x128xf32>
    %217 = vector.broadcast %216 : vector<1x128xf32> to vector<2x128xf32>
    %218 = arith.mulf %213, %217 : vector<2x128xf32>
    %c0_138 = arith.constant 0 : index
    %c0_139 = arith.constant 0 : index
    %219 = vector.load %arg14[%c0_138, %c0_139] : memref<1x128xf32, #tpu.memory_space<vmem>>, vector<1x128xf32>
    %220 = vector.broadcast %219 : vector<1x128xf32> to vector<2x128xf32>
    %221 = arith.mulf %218, %220 : vector<2x128xf32>
    %c0_140 = arith.constant 0 : index
    %c0_141 = arith.constant 0 : index
    %222 = vector.load %arg15[%c0_140, %c0_141] : memref<1x128xf32, #tpu.memory_space<vmem>>, vector<1x128xf32>
    %223 = vector.broadcast %222 : vector<1x128xf32> to vector<2x128xf32>
    %224 = arith.addf %221, %223 : vector<2x128xf32>
    %c0_142 = arith.constant 0 : index
    %c0_143 = arith.constant 0 : index
    %225 = vector.load %arg16[%c0_142, %c0_143] : memref<2x128xf32, #tpu.memory_space<vmem>>, vector<2x128xf32>
    tpu.vector_store %arg16[%c0_142, %c0_143], %224 {strides = array<i32>} : memref<2x128xf32, #tpu.memory_space<vmem>>, vector<2x128xf32>,
    return
  }
  func.func @transform_0(%arg0: i32) -> (i32, i32, i32) {
    %c0_i32 = arith.constant 0 : i32
    %c0_i32_0 = arith.constant 0 : i32
    %c0_i32_1 = arith.constant 0 : i32
    %c0_i32_2 = arith.constant 0 : i32
    return %c0_i32, %c0_i32_0, %c0_i32_1 : i32, i32, i32
  }
  func.func @transform_1(%arg0: i32) -> (i32, i32, i32) {
    %c0_i32 = arith.constant 0 : i32
    %c0_i32_0 = arith.constant 0 : i32
    %c0_i32_1 = arith.constant 0 : i32
    %c0_i32_2 = arith.constant 0 : i32
    return %c0_i32, %c0_i32_0, %c0_i32_1 : i32, i32, i32
  }
  func.func @transform_2(%arg0: i32) -> (i32, i32) {
    %c0_i32 = arith.constant 0 : i32
    %c0_i32_0 = arith.constant 0 : i32
    %c0_i32_1 = arith.constant 0 : i32
    return %c0_i32, %c0_i32_0 : i32, i32
  }
  func.func @transform_3(%arg0: i32) -> (i32, i32) {
    %c0_i32 = arith.constant 0 : i32
    %c0_i32_0 = arith.constant 0 : i32
    %c0_i32_1 = arith.constant 0 : i32
    return %c0_i32, %c0_i32_0 : i32, i32
  }
  func.func @transform_4(%arg0: i32) -> (i32, i32) {
    %c0_i32 = arith.constant 0 : i32
    %c0_i32_0 = arith.constant 0 : i32
    %c0_i32_1 = arith.constant 0 : i32
    return %c0_i32, %c0_i32_0 : i32, i32
  }
  func.func @transform_5(%arg0: i32) -> (i32, i32, i32) {
    %c0_i32 = arith.constant 0 : i32
    %c0_i32_0 = arith.constant 0 : i32
    %c0_i32_1 = arith.constant 0 : i32
    %c0_i32_2 = arith.constant 0 : i32
    return %c0_i32, %c0_i32_0, %c0_i32_1 : i32, i32, i32
  }
  func.func @transform_6(%arg0: i32) -> (i32, i32) {
    %c0_i32 = arith.constant 0 : i32
    %c0_i32_0 = arith.constant 0 : i32
    %c0_i32_1 = arith.constant 0 : i32
    return %c0_i32, %c0_i32_0 : i32, i32
  }
  func.func @transform_7(%arg0: i32) -> (i32, i32) {
    %c0_i32 = arith.constant 0 : i32
    %c0_i32_0 = arith.constant 0 : i32
    %c0_i32_1 = arith.constant 0 : i32
    return %c0_i32, %c0_i32_0 : i32, i32
  }
  func.func @transform_8(%arg0: i32) -> (i32, i32) {
    %c0_i32 = arith.constant 0 : i32
    %c0_i32_0 = arith.constant 0 : i32
    %c0_i32_1 = arith.constant 0 : i32
    return %c0_i32, %c0_i32_0 : i32, i32
  }
  func.func @transform_9(%arg0: i32) -> (i32, i32, i32) {
    %c0_i32 = arith.constant 0 : i32
    %c0_i32_0 = arith.constant 0 : i32
    %c0_i32_1 = arith.constant 0 : i32
    %c0_i32_2 = arith.constant 0 : i32
    return %c0_i32, %c0_i32_0, %c0_i32_1 : i32, i32, i32
  }
  func.func @transform_10(%arg0: i32) -> (i32, i32) {
    %c0_i32 = arith.constant 0 : i32
    %c0_i32_0 = arith.constant 0 : i32
    %c0_i32_1 = arith.constant 0 : i32
    return %c0_i32, %c0_i32_0 : i32, i32
  }
  func.func @transform_11(%arg0: i32) -> (i32, i32) {
    %c0_i32 = arith.constant 0 : i32
    %c0_i32_0 = arith.constant 0 : i32
    %c0_i32_1 = arith.constant 0 : i32
    return %c0_i32, %c0_i32_0 : i32, i32
  }
  func.func @transform_12(%arg0: i32) -> (i32, i32) {
    %c0_i32 = arith.constant 0 : i32
    %c0_i32_0 = arith.constant 0 : i32
    %c0_i32_1 = arith.constant 0 : i32
    return %c0_i32, %c0_i32_0 : i32, i32
  }
  func.func @transform_13(%arg0: i32) -> (i32, i32) {
    %c0_i32 = arith.constant 0 : i32
    %c0_i32_0 = arith.constant 0 : i32
    %c0_i32_1 = arith.constant 0 : i32
    return %c0_i32, %c0_i32_0 : i32, i32
  }
  func.func @transform_14(%arg0: i32) -> (i32, i32) {
    %c0_i32 = arith.constant 0 : i32
    %c0_i32_0 = arith.constant 0 : i32
    %c0_i32_1 = arith.constant 0 : i32
    return %c0_i32, %c0_i32_0 : i32, i32
  }
  func.func @transform_15(%arg0: i32) -> (i32, i32) {
    %c0_i32 = arith.constant 0 : i32
    %c0_i32_0 = arith.constant 0 : i32
    %c0_i32_1 = arith.constant 0 : i32
    return %c0_i32, %c0_i32_0 : i32, i32
  }
}

</mosaic_0001>

<bundles_post_ra>
// kernel: conv_msa_net_forward.1
= control target key start
LH: loop header
LB: loop body
LE: loop exit
PB: predicated region body
PF: predicated region fallthrough
CT: control target
= control target key end

     0   :  { %20 = vsyncpa [#allocation5], 0  ;;  %s4015_s0 = inlined_call_operand.vmem [shape: f32[2,16,64], index: 0, kind: input, shape index: {}]   ;;  %s4016_s1 = inlined_call_operand.hbm [shape: bf16[3,64,128], index: 1, kind: input, shape index: {}]   ;;  %s4017_s2 = inlined_call_operand.vmem [shape: f32[128,128], index: 2, kind: input, shape index: {}]   ;;  %s4018_s3 = inlined_call_operand.vmem [shape: f32[1,128], index: 3, kind: input, shape index: {}, may-alias: {3,7}]   ;;  %s4019_s4 = inlined_call_operand.vmem [shape: f32[1,128], index: 4, kind: input, shape index: {}, may-alias: {4,8,11,14}]   ;;  %s4020_s5 = inlined_call_operand.vmem [shape: bf16[3,128,128], index: 5, kind: input, shape index: {}]   ;;  %s4021_s6 = inlined_call_operand.vmem [shape: f32[128,128], index: 6, kind: input, shape index: {}]   ;;  %s4022_s7 = inlined_call_operand.vmem [shape: f32[1,128], index: 7, kind: input, shape index: {}, may-alias: {3,7}]   ;;  %s4023_s8 = inlined_call_operand.vmem [shape: f32[1,128], index: 8, kind: input, shape index: {}, may-alias: {4,8,11,14}]   ;;  %s4024_s9 = inlined_call_operand.hbm [shape: bf16[8,128,128], index: 9, kind: input, shape index: {}]   ;;  %s4025_s10 = inlined_call_operand.vmem [shape: f32[1,128], index: 10, kind: input, shape index: {}]   ;;  %s4026_s11 = inlined_call_operand.vmem [shape: f32[1,128], index: 11, kind: input, shape index: {}, may-alias: {4,8,11,14}]   ;;  %s4027_s12 = inlined_call_operand.hbm [shape: bf16[128,128], index: 12, kind: input, shape index: {}]   ;;  %s4028_s13 = inlined_call_operand.vmem [shape: f32[1,128], index: 13, kind: input, shape index: {}]   ;;  %s4029_s14 = inlined_call_operand.vmem [shape: f32[1,128], index: 14, kind: input, shape index: {}, may-alias: {4,8,11,14}]   ;;  %s4030_s15 = inlined_call_operand.hbm [shape: f32[2,128], index: 15, kind: output, shape index: {}]  }
   0x1   :  { %21 = vsyncpa [#allocation8], 0 }
   0x2   :  { %22 = vsyncpa [#allocation6], 0  ;;  %s3388_s18 = smov [#allocation7]   ;;  %s3389_s20 = smov [#allocation4]  }
   0x3   :  { %s56_s19 = sshll.u32 %s3388_s18, 4  ;;  %s30_s21 = sshll.u32 %s3389_s20, 4  ;;  %s57_s19 = int_to_ptr.vmem [resolvable:$true] %s56_s19  ;;  %s3477_s21 = int_to_ptr.vmem [resolvable:$true] %s30_s21 }
   0x4   :  { %s3294_s24 = scalar_lea.hbm %s4024_s9, 8192 }
   0x5   :  { %p3295_p0 = scmp.ne.s32.totalorder %s4024_s9, %s3294_s24  ;;  %p3298_p1 = scmp.lt.u32.totalorder %s3294_s24, %s4024_s9 }
   0x7   :  { %p3300_p2 = pnand %p3298_p1, %p3295_p0 }
   0x9   :  { %3303 = shalt.err (!%p3300_p2)
}
   0xa   :  { %s3304_s29 = scalar_lea.vmem %s57_s19, 8192  ;;  %p3309_p4 = scmp.lt.s32.totalorder %s57_s19, %s57_s19 }
   0xb   :  { %p3305_p3 = scmp.ne.s32.totalorder %s57_s19, %s3304_s29  ;;  %p3310_p5 = scmp.lt.s32.totalorder %s3304_s29, %s3304_s29 }
   0xd   :  { %p3311_p6 = por %p3310_p5, %p3309_p4 }
   0xf   :  { %p3312_p7 = pnand %p3311_p6, %p3305_p3 }
  0x11   :  { %3315 = shalt.err (!%p3312_p7)
}
  0x12   :  { %s3390_s30 = smov 64   ;;  %s3391_s16 = smov 4  }
  0x13   :  { %62 = dma.hbm_to_vmem [thread:$0]  %s4024_s9, 8192, %s57_s19, [#allocation8], %s3390_s30, %s3390_s30, %s3391_s16  }
  0x14   :  { %s3316_s23 = scalar_lea.hbm %s4016_s1, 1536 }
  0x15   :  { %p3317_p8 = scmp.ne.s32.totalorder %s4016_s1, %s3316_s23  ;;  %p3320_p9 = scmp.lt.u32.totalorder %s3316_s23, %s4016_s1 }
  0x17   :  { %p3322_p10 = pnand %p3320_p9, %p3317_p8 }
  0x19   :  { %3325 = shalt.err (!%p3322_p10)
}
  0x1a   :  { %s3326_s28 = scalar_lea.vmem %s3477_s21, 1536  ;;  %p3331_p12 = scmp.lt.s32.totalorder %s3477_s21, %s3477_s21 }
  0x1b   :  { %p3327_p11 = scmp.ne.s32.totalorder %s3477_s21, %s3326_s28  ;;  %p3332_p13 = scmp.lt.s32.totalorder %s3326_s28, %s3326_s28 }
  0x1d   :  { %p3333_p0 = por %p3332_p13, %p3331_p12 }
  0x1f   :  { %p3334_p1 = pnand %p3333_p0, %p3327_p11 }
  0x21   :  { %3337 = shalt.err (!%p3334_p1)
}
  0x22   :  { %36 = dma.hbm_to_vmem [thread:$0]  %s4016_s1, 1536, %s3477_s21, [#allocation5], %s3390_s30, %s3390_s30, %s3391_s16  }
  0x23   :  { %s3392_s29 = smov [#allocation9]   ;;  %s3338_s22 = scalar_lea.hbm %s4027_s12, 1024 }
  0x24   :  { %s72_s17 = sshll.u32 %s3392_s29, 4  ;;  %p3339_p2 = scmp.ne.s32.totalorder %s4027_s12, %s3338_s22  ;;  %s73_s17 = int_to_ptr.vmem [resolvable:$true] %s72_s17 }
  0x25   :  { %p3342_p3 = scmp.lt.u32.totalorder %s3338_s22, %s4027_s12 }
  0x27   :  { %p3344_p4 = pnand %p3342_p3, %p3339_p2 }
  0x29   :  { %3347 = shalt.err (!%p3344_p4)
}
  0x2a   :  { %s3348_s27 = scalar_lea.vmem %s73_s17, 1024  ;;  %p3353_p6 = scmp.lt.s32.totalorder %s73_s17, %s73_s17 }
  0x2b   :  { %p3349_p5 = scmp.ne.s32.totalorder %s73_s17, %s3348_s27  ;;  %p3354_p7 = scmp.lt.s32.totalorder %s3348_s27, %s3348_s27 }
  0x2d   :  { %p3355_p8 = por %p3354_p7, %p3353_p6 }
  0x2f   :  { %p3356_p9 = pnand %p3355_p8, %p3349_p5 }
  0x31   :  { %3359 = shalt.err (!%p3356_p9)
}
  0x32   :  { %78 = dma.hbm_to_vmem [thread:$0]  %s4027_s12, 1024, %s73_s17, [#allocation8], %s3390_s30, %s3390_s30, %s3391_s16  }
  0x33   :  { %3382 = dma.done.wait [#allocation5], 1536  }
  0x34   :  { %3383 = vsyncadd [#allocation5], 4294965760 }
  0x35   :  { %3384 = dma.done.wait [#allocation8], 9216  }
  0x36   :  { %3385 = vsyncadd [#allocation8], 4294958080  ;;  %vm97_vm0 = vcmask 516096   ;;  %v3393_v0 = vmov 0.0   ;;  %v3394_v1 = vmov 0.0|0.0   ;;  %v3178_v2 = vld [vmem:[#allocation4 + $0x20] sm:$0xff]  }
  0x37   :  { %619 = vst [vmem:[#allocation3 + $0x7] sm:$0x1] %v3393_v0  ;;  %620 = vst [vmem:[#allocation3 + $0x27] sm:$0x1] %v3393_v0  ;;  %3101 = vmatprep.subr.bf16.mxu1 %v3394_v1  ;;  %v3179_v3 = vld [vmem:[#allocation4 + $0x28] sm:$0xff]   ;;  %2613 = vmatprep.subr.bf16.mxu0 %v3178_v2  ;;  %vm102_vm1 = vcmask 523264  }
  0x38   :  { %98 = vst.msk [vmem:[#allocation2 + $0x7] sm:$0x1] %vm97_vm0, %v3393_v0  ;;  %99 = vst.msk [vmem:[#allocation2 + $0x27] sm:$0x1] %vm97_vm0, %v3393_v0  ;;  %2614 = vmatpush3.bf16.msra.mxu0 %v3178_v2  ;;  %v3180_v4 = vld [vmem:[#allocation4 + $0x30] sm:$0xff]   ;;  %v93_v5 = vld [vmem:[%s4015_s0] sm:$0xff] }
  0x39   :  { %100 = vst.msk [vmem:[#allocation2 + $0x18] sm:$0x1] %vm97_vm0, %v3393_v0  ;;  %101 = vst.msk [vmem:[#allocation2 + $0x38] sm:$0x1] %vm97_vm0, %v3393_v0  ;;  %2615 = vmatprep.subr.bf16.mxu0 %v3179_v3  ;;  %v94_v6 = vld [vmem:[%s4015_s0 + $0x8] sm:$0xff]  ;;  %v95_v7 = vld [vmem:[%s4015_s0 + $0x10] sm:$0xff] }
  0x3a   :  { %103 = vst.msk [vmem:[#allocation2 + $0x8] sm:$0xff] %vm102_vm1, %v93_v5  ;;  %104 = vst.msk [vmem:[#allocation2 + $0x10] sm:$0xff] %vm102_vm1, %v94_v6  ;;  %v96_v8 = vld [vmem:[%s4015_s0 + $0x18] sm:$0xff]  ;;  %v3182_v10 = vld [vmem:[#allocation4] sm:$0xff]   ;;  %vm3395_vm2 = vmmov 0   ;;  %vm1210_vm3 = vcmask 1041409  }
  0x3b   :  { %105 = vst.msk [vmem:[#allocation2 + $0x28] sm:$0xff] %vm102_vm1, %v95_v7  ;;  %106 = vst.msk [vmem:[#allocation2 + $0x30] sm:$0xff] %vm102_vm1, %v96_v8  ;;  %v3181_v9 = vld [vmem:[#allocation4 + $0x38] sm:$0xff]   ;;  %v3183_v20 = vld [vmem:[#allocation4 + $0x8] sm:$0xff]   ;;  %2846 = vmatprep.mubr.msk.f32.mxu1 %vm3395_vm2, %v3393_v0  ;;  %vm2060_vm4 = vcmask 1041408  }
  0x3c   :  { %2616 = vmatpush3.bf16.msra.mxu0 %v3179_v3  ;;  %v3184_v21 = vld [vmem:[#allocation4 + $0x10] sm:$0xff]   ;;  %v3185_v22 = vld [vmem:[#allocation4 + $0x18] sm:$0xff]   ;;  %v3186_v25 = vld [vmem:[#allocation4 + $0x40] sm:$0xff]  }
  0x3d   :  { %2617 = vmatprep.subr.bf16.mxu0 %v3180_v4  ;;  %v3187_v29 = vld [vmem:[#allocation4 + $0x48] sm:$0xff]   ;;  %v3188_v31 = vld [vmem:[#allocation4 + $0x50] sm:$0xff]   ;;  %v3189_v32 = vld [vmem:[#allocation4 + $0x58] sm:$0xff]  }
  0x3e   :  { %v414_v35 = vld [vmem:[%s4017_s2] sm:$0xff]  ;;  %v415_v36 = vld [vmem:[%s4017_s2 + $0x8] sm:$0xff]  ;;  %v416_v38 = vld [vmem:[%s4017_s2 + $0x10] sm:$0xff] }
  0x3f   :  { %v417_v39 = vld [vmem:[%s4017_s2 + $0x18] sm:$0xff]  ;;  %v3030_v40 = vpack.c.bf16 %v415_v36, %v414_v35  ;;  %v418_v41 = vld [vmem:[%s4017_s2 + $0x20] sm:$0xff]  ;;  %v419_v42 = vld [vmem:[%s4017_s2 + $0x28] sm:$0xff] }
  0x40   :  { %2618 = vmatpush3.bf16.msra.mxu0 %v3180_v4  ;;  %v3033_v43 = vpack.c.bf16 %v417_v39, %v416_v38  ;;  %v3036_v44 = vpack.c.bf16 %v419_v42, %v418_v41  ;;  %v420_v45 = vld [vmem:[%s4017_s2 + $0x30] sm:$0xff]  ;;  %v421_v46 = vld [vmem:[%s4017_s2 + $0x38] sm:$0xff]  ;;  %v422_v48 = vld [vmem:[%s4017_s2 + $0x40] sm:$0xff] }
  0x41   :  { %2619 = vmatprep.subr.bf16.mxu0 %v3181_v9  ;;  %v121_v11 = vld [vmem:[#allocation2 + $0x8] sm:$0xff]  ;;  %v122_v12 = vld [vmem:[#allocation2 + $0x10] sm:$0xff]  ;;  %v3039_v47 = vpack.c.bf16 %v421_v46, %v420_v45  ;;  %v425_v52 = vld [vmem:[%s4017_s2 + $0x58] sm:$0xff] }
  0x42   :  { %v107_v13 = vld [vmem:[#allocation2 + $0x7] sm:$0xff]  ;;  %v125_v14 = vpack.c.bf16 %v122_v12, %v121_v11  ;;  %v108_v16 = vld [vmem:[#allocation2 + $0xf] sm:$0xff]  ;;  %v429_v58 = vld [vmem:[%s4017_s2 + $0x78] sm:$0xff] }
  0x43   :  { %v123_v15 = vld [vmem:[#allocation2 + $0x28] sm:$0xff]  ;;  %v124_v17 = vld [vmem:[#allocation2 + $0x30] sm:$0xff]  ;;  %v111_v19 = vpack.c.bf16 %v108_v16, %v107_v13  ;;  %v426_v54 = vld [vmem:[%s4017_s2 + $0x60] sm:$0xff] }
  0x44   :  { %2620 = vmatpush3.bf16.msra.mxu0 %v3181_v9  ;;  %2621 = vmatprep.mubr.msk.bf16.mxu0 %vm102_vm1, %v125_v14  ;;  %v126_v18 = vpack.c.bf16 %v124_v17, %v123_v15  ;;  %v109_v23 = vld [vmem:[#allocation2 + $0x27] sm:$0xff]  ;;  %v110_v24 = vld [vmem:[#allocation2 + $0x2f] sm:$0xff] }
  0x45   :  { %2625 = vmatprep.subr.bf16.mxu0 %v3182_v10  ;;  %v294_v26 = vld [vmem:[#allocation2 + $0x9] sm:$0xff]  ;;  %v295_v27 = vld [vmem:[#allocation2 + $0x11] sm:$0xff]  ;;  %v112_v28 = vpack.c.bf16 %v110_v24, %v109_v23  ;;  %v3190_v24 = vld [vmem:[%s4020_s5 + $0x40] sm:$0xff]  }
  0x46   :  { %v298_v30 = vpack.c.bf16 %v295_v27, %v294_v26  ;;  %v296_v33 = vld [vmem:[#allocation2 + $0x29] sm:$0xff]  ;;  %v297_v34 = vld [vmem:[#allocation2 + $0x31] sm:$0xff] }
  0x47   :  { %2622 = vmatmul.mubr.msk.bf16.vlgmr.msra.gmra.mrb[0].mxu0 %vm102_vm1, %v126_v18  ;;  %v299_v37 = vpack.c.bf16 %v297_v34, %v296_v33  ;;  %v423_v49 = vld [vmem:[%s4017_s2 + $0x48] sm:$0xff]  ;;  %v424_v51 = vld [vmem:[%s4017_s2 + $0x50] sm:$0xff]  ;;  %v3193_v27 = vld [vmem:[%s4020_s5 + $0x58] sm:$0xff]  }
  0x48   :  { %2626 = vmatpush3.bf16.msra.mxu0 %v3182_v10  ;;  %2633 = vmatprep.mubr.msk.bf16.mxu0 %vm102_vm1, %v111_v19  ;;  %v3042_v50 = vpack.c.bf16 %v423_v49, %v422_v48  ;;  %v3045_v53 = vpack.c.bf16 %v425_v52, %v424_v51  ;;  %v427_v55 = vld [vmem:[%s4017_s2 + $0x68] sm:$0xff]  ;;  %v428_v57 = vld [vmem:[%s4017_s2 + $0x70] sm:$0xff]  ;;  %v981_v49 = vld [vmem:[%s4021_s6 + $0x20] sm:$0xff] }
  0x49   :  { %2627 = vmatprep.subr.bf16.mxu0 %v3183_v20  ;;  %v3048_v56 = vpack.c.bf16 %v427_v55, %v426_v54  ;;  %v3051_v59 = vpack.c.bf16 %v429_v58, %v428_v57  ;;  %v3192_v26 = vld [vmem:[%s4020_s5 + $0x50] sm:$0xff]  }
  0x4a   :  { %v979_v46 = vld [vmem:[%s4021_s6 + $0x10] sm:$0xff] }
  0x4b   :  { %v983_v52 = vld [vmem:[%s4021_s6 + $0x30] sm:$0xff] }
  0x4c   :  { %2628 = vmatpush3.bf16.msra.mxu0 %v3183_v20 }
  0x4d   :  { %2629 = vmatprep.subr.bf16.mxu0 %v3184_v21 }
  0x50   :  { %2630 = vmatpush3.bf16.msra.mxu0 %v3184_v21 }
  0x51   :  { %2631 = vmatprep.subr.bf16.mxu0 %v3185_v22 }
  0x54   :  { %2632 = vmatpush3.bf16.msra.mxu0 %v3185_v22 }
  0x55   :  { %2637 = vmatprep.subr.bf16.mxu0 %v3186_v25 }
  0x57   :  { %2634 = vmatmul.mubr.msk.bf16.vlgmr.msra.gmra.mrb[0].mxu0 %vm102_vm1, %v112_v28  ;;  %v3194_v28 = vld [vmem:[%s4020_s5 + $0x60] sm:$0xff]  }
  0x58   :  { %2638 = vmatpush3.bf16.msra.mxu0 %v3186_v25  ;;  %2645 = vmatprep.mubr.msk.bf16.mxu0 %vm102_vm1, %v298_v30  ;;  %v3191_v25 = vld [vmem:[%s4020_s5 + $0x48] sm:$0xff]   ;;  %v3196_v30 = vld [vmem:[%s4020_s5 + $0x70] sm:$0xff]  }
  0x59   :  { %2639 = vmatprep.subr.bf16.mxu0 %v3187_v29 }
  0x5c   :  { %2640 = vmatpush3.bf16.msra.mxu0 %v3187_v29  ;;  %v3195_v29 = vld [vmem:[%s4020_s5 + $0x68] sm:$0xff]  }
  0x5d   :  { %2641 = vmatprep.subr.bf16.mxu0 %v3188_v31 }
  0x60   :  { %2642 = vmatpush3.bf16.msra.mxu0 %v3188_v31  ;;  %v3197_v31 = vld [vmem:[%s4020_s5 + $0x78] sm:$0xff]  }
  0x61   :  { %2643 = vmatprep.subr.bf16.mxu0 %v3189_v32 }
  0x64   :  { %2644 = vmatpush3.bf16.msra.mxu0 %v3189_v32  ;;  %v575_v32 = vlaneseq }
  0x65   :  { %3029 = vmatprep.subr.bf16.mxu0 %v3394_v1 }
  0x66   :  { %v576_v33 = vshrl.u32 %v575_v32, 7 }
  0x67   :  { %2646 = vmatmul.mubr.msk.bf16.vlgmr.msra.gmra.mrb[0].mxu0 %vm102_vm1, %v299_v37 }
  0x68   :  { %3031 = vmatpush3.bf16.msra.mxu0 %v3030_v40  ;;  %2681 = vmatprep.mubr.msk.f32.mxu0 %vm3395_vm2, %v3393_v0  ;;  %v3683_v34 = vsub.s32 0, %v576_v33  ;;  %v3206_v33 = vld [vmem:[%s4020_s5 + $0x80] sm:$0xff]  }
  0x69   :  { %3032 = vmatprep.subr.bf16.mxu0 %v3394_v1 }
  0x6c   :  { %3034 = vmatpush3.bf16.msra.mxu0 %v3033_v43 }
  0x6d   :  { %3035 = vmatprep.subr.bf16.mxu0 %v3394_v1 }
  0x70   :  { %3037 = vmatpush3.bf16.msra.mxu0 %v3036_v44 }
  0x71   :  { %3038 = vmatprep.subr.bf16.mxu0 %v3394_v1 }
  0x74   :  { %3040 = vmatpush3.bf16.msra.mxu0 %v3039_v47 }
  0x75   :  { %3041 = vmatprep.subr.bf16.mxu0 %v3394_v1 }
  0x78   :  { %3043 = vmatpush3.bf16.msra.mxu0 %v3042_v50 }
  0x79   :  { %3044 = vmatprep.subr.bf16.mxu0 %v3394_v1 }
  0x7c   :  { %3046 = vmatpush3.bf16.msra.mxu0 %v3045_v53 }
  0x7d   :  { %3047 = vmatprep.subr.bf16.mxu0 %v3394_v1 }
  0x80   :  { %3049 = vmatpush3.bf16.msra.mxu0 %v3048_v56 }
  0x81   :  { %3050 = vmatprep.subr.bf16.mxu0 %v3394_v1 }
  0x84   :  { %3052 = vmatpush3.bf16.msra.mxu0 %v3051_v59 }
  0x85   :  { %3053 = vmatprep.subr.bf16.mxu0 %v3394_v1 }
 0x13a   :  { %v3619_v60 = vpop.f32.mrb[0].mxu0 }
 0x13b   :  { %v3621_v61 = vpop.f32.mrb[1].mxu0  ;;  %v403_v5 = vmul.f32 %v3619_v60, %v3619_v60 }
 0x13c   :  { %v3623_v62 = vpop.f32.mrb[2].mxu0  ;;  %v401_v2 = vmul.f32 %v3621_v61, %v3621_v61 }
 0x13d   :  { %v3625_v63 = vpop.f32.mrb[3].mxu0  ;;  %v404_v8 = vmul.f32 %v3623_v62, %v3623_v62 }
 0x13e   :  { %v392_v3 = vadd.f32 %v3625_v63, %v3621_v61  ;;  %v402_v4 = vmul.f32 %v3625_v63, %v3625_v63 }
 0x140   :  { %v393_v6 = vadd.f32 %v3619_v60, %v392_v3  ;;  %v405_v7 = vadd.f32 %v402_v4, %v401_v2  ;;  %v2283_v2 = vld [vmem:[%s4018_s3] ss:$0 sm:$0xff] }
 0x142   :  { %v394_v9 = vadd.f32 %v3623_v62, %v393_v6  ;;  %v406_v10 = vadd.f32 %v405_v7, %v403_v5  ;;  %v2284_v7 = vld [vmem:[%s4019_s4] ss:$0 sm:$0xff] }
 0x144   :  { %v395_v11 = vrot.slane %v394_v9, 4  ;;  %v407_v12 = vadd.f32 %v406_v10, %v404_v8 }
 0x146   :  { %v396_v13 = vadd.f32 %v395_v11, %v394_v9  ;;  %v408_v18 = vrot.slane %v407_v12, 4 }
 0x148   :  { %v397_v14 = vrot.slane %v396_v13, 2  ;;  %v409_v19 = vadd.f32 %v408_v18, %v407_v12 }
 0x14a   :  { %v398_v15 = vadd.f32 %v397_v14, %v396_v13  ;;  %v410_v20 = vrot.slane %v409_v19, 2 }
 0x14c   :  { %v399_v16 = vrot.slane %v398_v15, 1  ;;  %v411_v21 = vadd.f32 %v410_v20, %v409_v19 }
 0x14e   :  { %v400_v17 = vadd.f32 %v399_v16, %v398_v15  ;;  %v412_v22 = vrot.slane %v411_v21, 1 }
 0x150   :  { %2682 = vmatmul.mubr.f32.vlgmr.msra.gmra.mrb[4].mxu0 %v400_v17  ;;  %v413_v23 = vadd.f32 %v412_v22, %v411_v21  ;;  %v3198_v22 = vld [vmem:[%s4020_s5] sm:$0xff]  }
 0x151   :  { %3055 = vmatpush3.bf16.msra.mxu0 %v3030_v40  ;;  %2716 = vmatprep.mubr.msk.f32.mxu0 %vm3395_vm2, %v3393_v0 }
 0x152   :  { %3056 = vmatprep.subr.bf16.mxu0 %v3394_v1 }
 0x155   :  { %3058 = vmatpush3.bf16.msra.mxu0 %v3033_v43  ;;  %v977_v43 = vld [vmem:[%s4021_s6] sm:$0xff] }
 0x156   :  { %3059 = vmatprep.subr.bf16.mxu0 %v3394_v1 }
 0x159   :  { %3061 = vmatpush3.bf16.msra.mxu0 %v3036_v44  ;;  %v978_v44 = vld [vmem:[%s4021_s6 + $0x8] sm:$0xff] }
 0x15a   :  { %3062 = vmatprep.subr.bf16.mxu0 %v3394_v1  ;;  %v3696_v45 = vpack.c.bf16 %v978_v44, %v977_v43 }
 0x15c   :  { %3103 = vmatpush3.bf16.msra.mxu1 %v3696_v45 }
 0x15d   :  { %3064 = vmatpush3.bf16.msra.mxu0 %v3039_v47  ;;  %v980_v47 = vld [vmem:[%s4021_s6 + $0x18] sm:$0xff]  ;;  %3104 = vmatprep.subr.bf16.mxu1 %v3394_v1 }
 0x15e   :  { %3065 = vmatprep.subr.bf16.mxu0 %v3394_v1  ;;  %v3706_v48 = vpack.c.bf16 %v980_v47, %v979_v46  ;;  %v986_v47 = vld [vmem:[%s4021_s6 + $0x48] sm:$0xff] }
 0x160   :  { %3106 = vmatpush3.bf16.msra.mxu1 %v3706_v48 }
 0x161   :  { %3067 = vmatpush3.bf16.msra.mxu0 %v3042_v50  ;;  %v982_v50 = vld [vmem:[%s4021_s6 + $0x28] sm:$0xff]  ;;  %3107 = vmatprep.subr.bf16.mxu1 %v3394_v1 }
 0x162   :  { %3068 = vmatprep.subr.bf16.mxu0 %v3394_v1  ;;  %v3716_v51 = vpack.c.bf16 %v982_v50, %v981_v49  ;;  %v988_v50 = vld [vmem:[%s4021_s6 + $0x58] sm:$0xff] }
 0x164   :  { %3109 = vmatpush3.bf16.msra.mxu1 %v3716_v51 }
 0x165   :  { %3070 = vmatpush3.bf16.msra.mxu0 %v3045_v53  ;;  %v984_v53 = vld [vmem:[%s4021_s6 + $0x38] sm:$0xff]  ;;  %3110 = vmatprep.subr.bf16.mxu1 %v3394_v1 }
 0x166   :  { %3071 = vmatprep.subr.bf16.mxu0 %v3394_v1  ;;  %v3726_v54 = vpack.c.bf16 %v984_v53, %v983_v52  ;;  %v989_v52 = vld [vmem:[%s4021_s6 + $0x60] sm:$0xff]  ;;  %v990_v53 = vld [vmem:[%s4021_s6 + $0x68] sm:$0xff] }
 0x168   :  { %3112 = vmatpush3.bf16.msra.mxu1 %v3726_v54 }
 0x169   :  { %3073 = vmatpush3.bf16.msra.mxu0 %v3048_v56  ;;  %3113 = vmatprep.subr.bf16.mxu1 %v3394_v1 }
 0x16a   :  { %3074 = vmatprep.subr.bf16.mxu0 %v3394_v1 }
 0x16d   :  { %3076 = vmatpush3.bf16.msra.mxu0 %v3051_v59 }
 0x16e   :  { %2719 = vmatprep.subr.bf16.mxu0 %v3393_v0 }
 0x170   :  { %2717 = vmatmul.mubr.f32.vlgmr.msra.gmra.mrb[6].mxu0 %v413_v23 }
 0x171   :  { %2735 = vmatprep.mubr.msk.bf16.mxu0 %vm3395_vm2, %v3393_v0  ;;  %2720 = vmatpush3.bf16.msra.mxu0 %v3190_v24  ;;  %v3199_v24 = vld [vmem:[%s4020_s5 + $0x8] sm:$0xff]  }
 0x172   :  { %2721 = vmatprep.subr.bf16.mxu0 %v3393_v0 }
 0x175   :  { %2722 = vmatpush3.bf16.msra.mxu0 %v3191_v25  ;;  %v3200_v25 = vld [vmem:[%s4020_s5 + $0x10] sm:$0xff]  }
 0x176   :  { %2723 = vmatprep.subr.bf16.mxu0 %v3393_v0 }
 0x179   :  { %2724 = vmatpush3.bf16.msra.mxu0 %v3192_v26  ;;  %v3201_v26 = vld [vmem:[%s4020_s5 + $0x18] sm:$0xff]  }
 0x17a   :  { %2725 = vmatprep.subr.bf16.mxu0 %v3393_v0 }
 0x17d   :  { %2726 = vmatpush3.bf16.msra.mxu0 %v3193_v27  ;;  %v3202_v27 = vld [vmem:[%s4020_s5 + $0x20] sm:$0xff]  }
 0x17e   :  { %2727 = vmatprep.subr.bf16.mxu0 %v3393_v0 }
 0x181   :  { %2728 = vmatpush3.bf16.msra.mxu0 %v3194_v28  ;;  %v3203_v28 = vld [vmem:[%s4020_s5 + $0x28] sm:$0xff]  }
 0x182   :  { %2729 = vmatprep.subr.bf16.mxu0 %v3393_v0 }
 0x185   :  { %2730 = vmatpush3.bf16.msra.mxu0 %v3195_v29  ;;  %v3204_v29 = vld [vmem:[%s4020_s5 + $0x30] sm:$0xff]  }
 0x186   :  { %2731 = vmatprep.subr.bf16.mxu0 %v3393_v0 }
 0x189   :  { %2732 = vmatpush3.bf16.msra.mxu0 %v3196_v30  ;;  %v3205_v30 = vld [vmem:[%s4020_s5 + $0x38] sm:$0xff]  }
 0x18a   :  { %2733 = vmatprep.subr.bf16.mxu0 %v3393_v0 }
 0x18d   :  { %2734 = vmatpush3.bf16.msra.mxu0 %v3197_v31 }
 0x18e   :  { %2739 = vmatprep.subr.bf16.mxu0 %v3393_v0 }
 0x223   :  { %v496_v35 = vpop.f32.mrb[4].mxu0 }
 0x224   :  { %v500_v36 = vmul.f32 0.001953125, %v496_v35  ;;  %v2683_v37 = vpop.f32.mrb[5].mxu0 }
 0x225   :  { %v3208_v37 = vld [vmem:[%s4020_s5 + $0x90] sm:$0xff]  }
 0x226   :  { %v578_v38 = vrot.slane %v500_v36, %v3683_v34  ;;  %v572_v56 = vmul.f32 %v500_v36, %v500_v36  ;;  %v3207_v36 = vld [vmem:[%s4020_s5 + $0x88] sm:$0xff]  }
 0x228   :  { %v579_v39 = vsub.f32 %v3621_v61, %v578_v38  ;;  %v580_v40 = vsub.f32 %v3625_v63, %v578_v38  ;;  %v581_v41 = vsub.f32 %v3619_v60, %v578_v38  ;;  %v582_v42 = vsub.f32 %v3623_v62, %v578_v38  ;;  %v3209_v38 = vld [vmem:[%s4020_s5 + $0x98] sm:$0xff]  }
 0x243   :  { %v567_v55 = vpop.f32.mrb[6].mxu0 }
 0x244   :  { %v571_v57 = vmul.f32 0.001953125, %v567_v55  ;;  %v2718_v58 = vpop.f32.mrb[7].mxu0  ;;  %v991_v55 = vld [vmem:[%s4021_s6 + $0x70] sm:$0xff] }
 0x246   :  { %v573_v59 = vsub.f32 %v571_v57, %v572_v56  ;;  %v992_v56 = vld [vmem:[%s4021_s6 + $0x78] sm:$0xff] }
 0x247   :  { %v3099_v57 = vpack.c.bf16 %v992_v56, %v991_v55 }
 0x248   :  { %v574_v60 = vmax.f32 %v573_v59, 0.0 }
 0x24a   :  { %v583_v61 = vadd.f32 1e-05, %v574_v60 }
 0x24c   :  { %3286 = vrsqrt.f32 %v583_v61 }
 0x256   :  { %v3287_v62 = vpop.eup %3286 }
 0x257   :  { %v588_v63 = vrot.slane %v3287_v62, %v3683_v34 }
 0x259   :  { %v589_v3 = vmul.f32 %v588_v63, %v579_v39  ;;  %v590_v4 = vmul.f32 %v588_v63, %v580_v40  ;;  %v591_v5 = vmul.f32 %v588_v63, %v581_v41  ;;  %v592_v6 = vmul.f32 %v588_v63, %v582_v42  ;;  %v3210_v39 = vld [vmem:[%s4020_s5 + $0xa0] sm:$0xff]   ;;  %v3211_v40 = vld [vmem:[%s4020_s5 + $0xa8] sm:$0xff]   ;;  %v3212_v41 = vld [vmem:[%s4020_s5 + $0xb0] sm:$0xff]  }
 0x25a   :  { %v3213_v42 = vld [vmem:[%s4020_s5 + $0xb8] sm:$0xff]   ;;  %s3396_s5 = smov [#allocation10]  }
 0x25b   :  { %v600_v8 = vmul.f32 %v2283_v2, %v589_v3  ;;  %v601_v9 = vmul.f32 %v2283_v2, %v590_v4  ;;  %v602_v10 = vmul.f32 %v2283_v2, %v591_v5  ;;  %v603_v11 = vmul.f32 %v2283_v2, %v592_v6  ;;  %s2255_s19 = sshll.u32 %s3396_s5, 4  ;;  %s2256_s19 = int_to_ptr.vmem [resolvable:$true] %s2255_s19 }
 0x25c   :  { %s3360_s29 = scalar_lea.vmem %s2256_s19, 32  ;;  %p3365_p11 = scmp.lt.s32.totalorder %s2256_s19, %s2256_s19 }
 0x25d   :  { %v611_v12 = vadd.f32 %v2284_v7, %v600_v8  ;;  %v612_v13 = vadd.f32 %v2284_v7, %v601_v9  ;;  %v613_v14 = vadd.f32 %v2284_v7, %v602_v10  ;;  %v614_v15 = vadd.f32 %v2284_v7, %v603_v11  ;;  %p3361_p10 = scmp.ne.s32.totalorder %s2256_s19, %s3360_s29  ;;  %p3366_p12 = scmp.lt.s32.totalorder %s3360_s29, %s3360_s29 }
 0x25f   :  { %v615_v16 = vmax.f32 %v611_v12, 0.0  ;;  %v616_v17 = vmax.f32 %v612_v13, 0.0  ;;  %v617_v18 = vmax.f32 %v613_v14, 0.0  ;;  %v618_v19 = vmax.f32 %v614_v15, 0.0  ;;  %v3214_v15 = vld [vmem:[#allocation7 + $0x40] sm:$0xff]   ;;  %p3367_p13 = por %p3366_p12, %p3365_p11 }
 0x261   :  { %623 = vst [vmem:[#allocation3 + $0x8] sm:$0xff] %v615_v16  ;;  %624 = vst [vmem:[#allocation3 + $0x10] sm:$0xff] %v616_v17  ;;  %v3215_v16 = vld [vmem:[#allocation7 + $0x48] sm:$0xff]   ;;  %v3216_v17 = vld [vmem:[#allocation7 + $0x50] sm:$0xff]   ;;  %p3368_p0 = pnand %p3367_p13, %p3361_p10 }
 0x262   :  { %625 = vst [vmem:[#allocation3 + $0x28] sm:$0xff] %v617_v18  ;;  %626 = vst [vmem:[#allocation3 + $0x30] sm:$0xff] %v618_v19  ;;  %v3217_v18 = vld [vmem:[#allocation7 + $0x58] sm:$0xff]   ;;  %v3218_v19 = vld [vmem:[#allocation7 + $0x60] sm:$0xff]  }
 0x268   :  { %v649_v20 = vld [vmem:[#allocation3 + $0x8] ss:$2 sm:$0xff]  ;;  %v628_v31 = vld [vmem:[#allocation3 + $0x7] ss:$2 sm:$0xff] }
 0x269   :  { %v651_v21 = vld [vmem:[#allocation3 + $0x28] ss:$2 sm:$0xff]  ;;  %v630_v32 = vld [vmem:[#allocation3 + $0x27] ss:$2 sm:$0xff] }
 0x26a   :  { %v652_v23 = vpack.c.bf16 %v651_v21, %v649_v20  ;;  %v631_v35 = vpack.c.bf16 %v630_v32, %v628_v31  ;;  %v849_v43 = vld [vmem:[#allocation3 + $0x9] ss:$2 sm:$0xff] }
 0x26b   :  { %v851_v44 = vld [vmem:[#allocation3 + $0x29] ss:$2 sm:$0xff] }
 0x26c   :  { %2736 = vmatmul.mubr.bf16.vlgmr.msra.gmra.mrb[8].mxu0 %v652_v23  ;;  %v852_v46 = vpack.c.bf16 %v851_v44, %v849_v43  ;;  %v3219_v20 = vld [vmem:[#allocation7 + $0x68] sm:$0xff]   ;;  %v3220_v21 = vld [vmem:[#allocation7 + $0x70] sm:$0xff]  }
 0x26d   :  { %2740 = vmatpush3.bf16.msra.mxu0 %v3198_v22  ;;  %2755 = vmatprep.mubr.msk.bf16.mxu0 %vm3395_vm2, %v3393_v0  ;;  %v3221_v22 = vld [vmem:[#allocation7 + $0x78] sm:$0xff]  }
 0x26e   :  { %2741 = vmatprep.subr.bf16.mxu0 %v3393_v0 }
 0x271   :  { %2742 = vmatpush3.bf16.msra.mxu0 %v3199_v24 }
 0x272   :  { %2743 = vmatprep.subr.bf16.mxu0 %v3393_v0 }
 0x275   :  { %2744 = vmatpush3.bf16.msra.mxu0 %v3200_v25 }
 0x276   :  { %2745 = vmatprep.subr.bf16.mxu0 %v3393_v0 }
 0x279   :  { %2746 = vmatpush3.bf16.msra.mxu0 %v3201_v26 }
 0x27a   :  { %2747 = vmatprep.subr.bf16.mxu0 %v3393_v0 }
 0x27d   :  { %2748 = vmatpush3.bf16.msra.mxu0 %v3202_v27 }
 0x27e   :  { %2749 = vmatprep.subr.bf16.mxu0 %v3393_v0 }
 0x281   :  { %2750 = vmatpush3.bf16.msra.mxu0 %v3203_v28 }
 0x282   :  { %2751 = vmatprep.subr.bf16.mxu0 %v3393_v0 }
 0x285   :  { %2752 = vmatpush3.bf16.msra.mxu0 %v3204_v29 }
 0x286   :  { %2753 = vmatprep.subr.bf16.mxu0 %v3393_v0 }
 0x289   :  { %2754 = vmatpush3.bf16.msra.mxu0 %v3205_v30 }
 0x28a   :  { %2759 = vmatprep.subr.bf16.mxu0 %v3393_v0 }
 0x28c   :  { %2756 = vmatmul.mubr.bf16.vlgmr.msra.gmra.mrb[8].mxu0 %v631_v35 }
 0x28d   :  { %2760 = vmatpush3.bf16.msra.mxu0 %v3206_v33  ;;  %2775 = vmatprep.mubr.msk.bf16.mxu0 %vm3395_vm2, %v3393_v0 }
 0x28e   :  { %2761 = vmatprep.subr.bf16.mxu0 %v3393_v0 }
 0x291   :  { %2762 = vmatpush3.bf16.msra.mxu0 %v3207_v36 }
 0x292   :  { %2763 = vmatprep.subr.bf16.mxu0 %v3393_v0 }
 0x295   :  { %2764 = vmatpush3.bf16.msra.mxu0 %v3208_v37 }
 0x296   :  { %2765 = vmatprep.subr.bf16.mxu0 %v3393_v0 }
 0x299   :  { %2766 = vmatpush3.bf16.msra.mxu0 %v3209_v38 }
 0x29a   :  { %2767 = vmatprep.subr.bf16.mxu0 %v3393_v0 }
 0x29d   :  { %2768 = vmatpush3.bf16.msra.mxu0 %v3210_v39  ;;  %v2341_v39 = vld [vmem:[%s4022_s7] ss:$0 sm:$0xff] }
 0x29e   :  { %2769 = vmatprep.subr.bf16.mxu0 %v3393_v0 }
 0x2a1   :  { %2770 = vmatpush3.bf16.msra.mxu0 %v3211_v40 }
 0x2a2   :  { %2771 = vmatprep.subr.bf16.mxu0 %v3393_v0 }
 0x2a5   :  { %2772 = vmatpush3.bf16.msra.mxu0 %v3212_v41 }
 0x2a6   :  { %2773 = vmatprep.subr.bf16.mxu0 %v3393_v0 }
 0x2a9   :  { %2774 = vmatpush3.bf16.msra.mxu0 %v3213_v42  ;;  %v2342_v42 = vld [vmem:[%s4023_s8] ss:$0 sm:$0xff] }
 0x2aa   :  { %3077 = vmatprep.subr.bf16.mxu0 %v3394_v1 }
 0x2ac   :  { %2776 = vmatmul.mubr.bf16.vlgmr.msra.gmra.mrb[8].mxu0 %v852_v46 }
 0x2ad   :  { %3079 = vmatpush3.bf16.msra.mxu0 %v3696_v45  ;;  %2811 = vmatprep.mubr.msk.f32.mxu0 %vm3395_vm2, %v3393_v0  ;;  %v985_v45 = vld [vmem:[%s4021_s6 + $0x40] sm:$0xff] }
 0x2ae   :  { %3080 = vmatprep.subr.bf16.mxu0 %v3394_v1  ;;  %v3090_v49 = vpack.c.bf16 %v986_v47, %v985_v45 }
 0x2b0   :  { %3115 = vmatpush3.bf16.msra.mxu1 %v3090_v49 }
 0x2b1   :  { %3082 = vmatpush3.bf16.msra.mxu0 %v3706_v48  ;;  %v987_v48 = vld [vmem:[%s4021_s6 + $0x50] sm:$0xff]  ;;  %3116 = vmatprep.subr.bf16.mxu1 %v3394_v1 }
 0x2b2   :  { %3083 = vmatprep.subr.bf16.mxu0 %v3394_v1 }
 0x2b5   :  { %3085 = vmatpush3.bf16.msra.mxu0 %v3716_v51  ;;  %v3093_v51 = vpack.c.bf16 %v988_v50, %v987_v48 }
 0x2b6   :  { %3086 = vmatprep.subr.bf16.mxu0 %v3394_v1 }
 0x2b7   :  { %3118 = vmatpush3.bf16.msra.mxu1 %v3093_v51 }
 0x2b8   :  { %3119 = vmatprep.subr.bf16.mxu1 %v3394_v1 }
 0x2b9   :  { %3088 = vmatpush3.bf16.msra.mxu0 %v3726_v54  ;;  %v3096_v54 = vpack.c.bf16 %v990_v53, %v989_v52 }
 0x2ba   :  { %3089 = vmatprep.subr.bf16.mxu0 %v3394_v1 }
 0x2bb   :  { %3121 = vmatpush3.bf16.msra.mxu1 %v3096_v54 }
 0x2bc   :  { %3122 = vmatprep.subr.bf16.mxu1 %v3394_v1 }
 0x2bd   :  { %3091 = vmatpush3.bf16.msra.mxu0 %v3090_v49 }
 0x2be   :  { %3092 = vmatprep.subr.bf16.mxu0 %v3394_v1 }
 0x2bf   :  { %3124 = vmatpush3.bf16.msra.mxu1 %v3099_v57 }
 0x2c0   :  { %2849 = vmatprep.subr.bf16.mxu1 %v3393_v0 }
 0x2c1   :  { %3094 = vmatpush3.bf16.msra.mxu0 %v3093_v51 }
 0x2c2   :  { %3095 = vmatprep.subr.bf16.mxu0 %v3394_v1 }
 0x2c5   :  { %3097 = vmatpush3.bf16.msra.mxu0 %v3096_v54 }
 0x2c6   :  { %3098 = vmatprep.subr.bf16.mxu0 %v3394_v1 }
 0x2c9   :  { %3100 = vmatpush3.bf16.msra.mxu0 %v3099_v57 }
 0x2ca   :  { %3009 = vmatprep.subr.bf16.mxu0 %v3393_v0 }
 0x37f   :  { %v3847_v58 = vpop.f32.mrb[8].mxu0 }
 0x380   :  { %v2777_v59 = vpop.f32.mrb[9].mxu0  ;;  %v968_v61 = vmul.f32 %v3847_v58, %v3847_v58 }
 0x381   :  { %v3849_v60 = vpop.f32.mrb[10].mxu0  ;;  %v3222_v59 = vld [vmem:[#allocation7] sm:$0xff]  }
 0x382   :  { %v961_v62 = vadd.f32 %v3849_v60, %v3847_v58  ;;  %v969_v1 = vmul.f32 %v3849_v60, %v3849_v60  ;;  %v2778_v63 = vpop.f32.mrb[11].mxu0 }
 0x384   :  { %v962_v2 = vrot.slane %v961_v62, 4  ;;  %v970_v3 = vadd.f32 %v969_v1, %v968_v61 }
 0x386   :  { %v963_v4 = vadd.f32 %v962_v2, %v961_v62  ;;  %v971_v5 = vrot.slane %v970_v3, 4 }
 0x388   :  { %v964_v6 = vrot.slane %v963_v4, 2  ;;  %v972_v7 = vadd.f32 %v971_v5, %v970_v3 }
 0x38a   :  { %v965_v8 = vadd.f32 %v964_v6, %v963_v4  ;;  %v973_v9 = vrot.slane %v972_v7, 2 }
 0x38c   :  { %v966_v10 = vrot.slane %v965_v8, 1  ;;  %v974_v11 = vadd.f32 %v973_v9, %v972_v7 }
 0x38e   :  { %v967_v12 = vadd.f32 %v966_v10, %v965_v8  ;;  %v975_v13 = vrot.slane %v974_v11, 1  ;;  %v3223_v8 = vld [vmem:[#allocation7 + $0x8] sm:$0xff]  }
 0x390   :  { %2812 = vmatmul.mubr.f32.vlgmr.msra.gmra.mrb[12].mxu0 %v967_v12  ;;  %v976_v14 = vadd.f32 %v975_v13, %v974_v11  ;;  %v3224_v12 = vld [vmem:[#allocation7 + $0x10] sm:$0xff]   ;;  %v3225_v13 = vld [vmem:[#allocation7 + $0x18] sm:$0xff]  }
 0x391   :  { %3025 = vmatprep.mubr.msk.bf16.mxu0 %vm3395_vm2, %v3393_v0 }
 0x392   :  { %2847 = vmatmul.mubr.f32.vlgmr.msra.gmra.mrb[0].mxu1 %v976_v14  ;;  %v3226_v14 = vld [vmem:[#allocation7 + $0x20] sm:$0xff]  }
 0x393   :  { %2865 = vmatprep.mubr.msk.bf16.mxu1 %vm3395_vm2, %v3393_v0  ;;  %2850 = vmatpush3.bf16.msra.mxu1 %v3214_v15  ;;  %v3227_v15 = vld [vmem:[#allocation7 + $0x28] sm:$0xff]  }
 0x394   :  { %2851 = vmatprep.subr.bf16.mxu1 %v3393_v0 }
 0x397   :  { %2852 = vmatpush3.bf16.msra.mxu1 %v3215_v16  ;;  %v3228_v16 = vld [vmem:[#allocation7 + $0x30] sm:$0xff]  }
 0x398   :  { %2853 = vmatprep.subr.bf16.mxu1 %v3393_v0 }
 0x39b   :  { %2854 = vmatpush3.bf16.msra.mxu1 %v3216_v17  ;;  %v3229_v17 = vld [vmem:[#allocation7 + $0x38] sm:$0xff]  }
 0x39c   :  { %2855 = vmatprep.subr.bf16.mxu1 %v3393_v0 }
 0x39f   :  { %2856 = vmatpush3.bf16.msra.mxu1 %v3217_v18  ;;  %v3230_v18 = vld [vmem:[#allocation7 + $0x80] sm:$0xff]  }
 0x3a0   :  { %2857 = vmatprep.subr.bf16.mxu1 %v3393_v0 }
 0x3a3   :  { %2858 = vmatpush3.bf16.msra.mxu1 %v3218_v19 }
 0x3a4   :  { %2859 = vmatprep.subr.bf16.mxu1 %v3393_v0 }
 0x3a7   :  { %2860 = vmatpush3.bf16.msra.mxu1 %v3219_v20  ;;  %v3231_v20 = vld [vmem:[#allocation7 + $0x88] sm:$0xff]  }
 0x3a8   :  { %2861 = vmatprep.subr.bf16.mxu1 %v3393_v0 }
 0x3ab   :  { %2862 = vmatpush3.bf16.msra.mxu1 %v3220_v21  ;;  %v3232_v21 = vld [vmem:[#allocation7 + $0x90] sm:$0xff]  }
 0x3ac   :  { %2863 = vmatprep.subr.bf16.mxu1 %v3393_v0 }
 0x3af   :  { %2864 = vmatpush3.bf16.msra.mxu1 %v3221_v22  ;;  %v3233_v22 = vld [vmem:[#allocation7 + $0x98] sm:$0xff]  }
 0x3b0   :  { %2869 = vmatprep.subr.bf16.mxu1 %v3393_v0 }
 0x463   :  { %v1059_v23 = vpop.f32.mrb[12].mxu0 }
 0x464   :  { %v1063_v24 = vmul.f32 0.0078125, %v1059_v23  ;;  %v2813_v25 = vpop.f32.mrb[13].mxu0  ;;  %v3234_v23 = vld [vmem:[#allocation7 + $0xa0] sm:$0xff]  }
 0x465   :  { %v1130_v26 = vpop.f32.mrb[0].mxu1  ;;  %v3236_v25 = vld [vmem:[#allocation7 + $0xb0] sm:$0xff]  }
 0x466   :  { %v1135_v27 = vmul.f32 %v1063_v24, %v1063_v24  ;;  %v1141_v28 = vrot.slane %v1063_v24, %v3683_v34  ;;  %v1134_v29 = vmul.f32 0.0078125, %v1130_v26  ;;  %v2848_v30 = vpop.f32.mrb[1].mxu1  ;;  %v3235_v24 = vld [vmem:[#allocation7 + $0xa8] sm:$0xff]   ;;  %v3237_v26 = vld [vmem:[#allocation7 + $0xb8] sm:$0xff]  }
 0x467   :  { %v3240_v30 = vld [vmem:[#allocation7 + $0xd0] sm:$0xff]  }
 0x468   :  { %v1142_v31 = vsub.f32 %v3847_v58, %v1141_v28  ;;  %v1143_v32 = vsub.f32 %v3849_v60, %v1141_v28  ;;  %v1136_v33 = vsub.f32 %v1134_v29, %v1135_v27  ;;  %v3238_v27 = vld [vmem:[#allocation7 + $0xc0] sm:$0xff]   ;;  %v3239_v29 = vld [vmem:[#allocation7 + $0xc8] sm:$0xff]  }
 0x46a   :  { %v1137_v35 = vmax.f32 %v1136_v33, 0.0  ;;  %v3243_v33 = vld [vmem:[#allocation7 + $0xe8] sm:$0xff]  }
 0x46c   :  { %v1144_v36 = vadd.f32 1e-05, %v1137_v35  ;;  %v3244_v35 = vld [vmem:[#allocation7 + $0xf0] sm:$0xff]  }
 0x46e   :  { %3288 = vrsqrt.f32 %v1144_v36  ;;  %v3245_v36 = vld [vmem:[#allocation7 + $0xf8] sm:$0xff]  }
 0x478   :  { %v3289_v37 = vpop.eup %3288 }
 0x479   :  { %v1149_v38 = vrot.slane %v3289_v37, %v3683_v34  ;;  %v3246_v37 = vld [vmem:[#allocation7 + $0x100] sm:$0xff]  }
 0x47b   :  { %v1150_v40 = vmul.f32 %v1149_v38, %v1142_v31  ;;  %v1151_v41 = vmul.f32 %v1149_v38, %v1143_v32  ;;  %v3241_v31 = vld [vmem:[#allocation7 + $0xd8] sm:$0xff]   ;;  %v3242_v32 = vld [vmem:[#allocation7 + $0xe0] sm:$0xff]  }
 0x47d   :  { %v1159_v43 = vmul.f32 %v2341_v39, %v1150_v40  ;;  %v1160_v44 = vmul.f32 %v2341_v39, %v1151_v41  ;;  %v3247_v39 = vld [vmem:[#allocation7 + $0x108] sm:$0xff]   ;;  %v3248_v40 = vld [vmem:[#allocation7 + $0x110] sm:$0xff]   ;;  %v3249_v41 = vld [vmem:[#allocation7 + $0x118] sm:$0xff]  }
 0x47f   :  { %v1168_v46 = vadd.f32 %v2342_v42, %v1159_v43  ;;  %v1169_v45 = vadd.f32 %v2342_v42, %v1160_v44  ;;  %v3250_v42 = vld [vmem:[#allocation7 + $0x120] sm:$0xff]   ;;  %v3251_v43 = vld [vmem:[#allocation7 + $0x128] sm:$0xff]   ;;  %v3252_v44 = vld [vmem:[#allocation7 + $0x130] sm:$0xff]  }
 0x481   :  { %v1170_v47 = vpack.c.bf16 %v1168_v46, %v1168_v46  ;;  %v1171_v49 = vpack.c.bf16 %v1169_v45, %v1169_v45  ;;  %v3253_v46 = vld [vmem:[#allocation7 + $0x138] sm:$0xff]   ;;  %v3254_v45 = vld [vmem:[#allocation7 + $0x140] sm:$0xff]  }
 0x483   :  { %v1207_v48 = vunpack.c.l.b16 %v1170_v47  ;;  %v1208_v50 = vunpack.c.l.b16 %v1171_v49  ;;  %v3255_v49 = vld [vmem:[#allocation7 + $0x148] sm:$0xff]  }
 0x485   :  { %v1209_v34 = vrot.slane %v1207_v48, 1  ;;  %v1302_v51 = vrot.slane %v1208_v50, 7  ;;  %v1411_v52 = vrot.slane %v1207_v48, 2  ;;  %v1412_v53 = vrot.slane %v1208_v50, 1 }
 0x486   :  { %v1522_v54 = vrot.slane %v1207_v48, 3  ;;  %v1523_v55 = vrot.slane %v1208_v50, 2  ;;  %v1633_v56 = vrot.slane %v1207_v48, 4  ;;  %v1634_v57 = vrot.slane %v1208_v50, 3 }
 0x487   :  { %v1211_v58 = vsel %vm1210_vm3, %v1208_v50, %v1209_v34  ;;  %v1303_v60 = vsel %vm1210_vm3, %v1302_v51, %v1207_v48  ;;  %v3882_v61 = vsel %vm1210_vm3, %v1412_v53, %v1411_v52  ;;  %v1744_v62 = vrot.slane %v1207_v48, 5  ;;  %v3258_v34 = vld [vmem:[#allocation7 + $0x160] sm:$0xff]   ;;  %v3259_v51 = vld [vmem:[#allocation7 + $0x168] sm:$0xff]   ;;  %v3260_v52 = vld [vmem:[#allocation7 + $0x170] sm:$0xff]  }
 0x488   :  { %v1212_v1 = vpack.c.b16 %v1211_v58, %v1211_v58  ;;  %v3885_v63 = vsel %vm1210_vm3, %v1523_v55, %v1522_v54  ;;  %v3888_v2 = vsel %vm1210_vm3, %v1634_v57, %v1633_v56  ;;  %v1745_v3 = vrot.slane %v1208_v50, 4  ;;  %v3261_v53 = vld [vmem:[#allocation7 + $0x178] sm:$0xff]   ;;  %v3262_v54 = vld [vmem:[#allocation7 + $0x180] sm:$0xff]   ;;  %v3263_v56 = vld [vmem:[#allocation7 + $0x188] sm:$0xff]  }
 0x489   :  { %v1855_v4 = vrot.slane %v1207_v48, 6  ;;  %v1856_v5 = vrot.slane %v1208_v50, 5  ;;  %v1966_v6 = vrot.slane %v1207_v48, 7  ;;  %v1967_v7 = vrot.slane %v1208_v50, 6  ;;  %v3256_v48 = vld [vmem:[#allocation7 + $0x150] sm:$0xff]   ;;  %v3257_v50 = vld [vmem:[#allocation7 + $0x158] sm:$0xff]  }
 0x48a   :  { %2866 = vmatmul.mubr.bf16.vlgmr.msra.gmra.mrb[4].mxu1 %v1212_v1  ;;  %v3893_v9 = vsel %vm1210_vm3, %v1745_v3, %v1744_v62  ;;  %v1304_v19 = vpack.c.b16 %v1303_v60, %v1303_v60  ;;  %v1414_v28 = vpack.c.b16 %v3882_v61, %v3882_v61  ;;  %v1525_v38 = vpack.c.b16 %v3885_v63, %v3885_v63  ;;  %v3264_v57 = vld [vmem:[#allocation7 + $0x190] sm:$0xff]   ;;  %v3265_v58 = vld [vmem:[#allocation7 + $0x198] sm:$0xff]   ;;  %v3267_v60 = vld [vmem:[#allocation7 + $0x1a8] sm:$0xff]  }
 0x48b   :  { %2870 = vmatpush3.bf16.msra.mxu1 %v3222_v59  ;;  %2885 = vmatprep.mubr.msk.bf16.mxu1 %vm3395_vm2, %v3393_v0  ;;  %v3897_v10 = vsel %vm1210_vm3, %v1856_v5, %v1855_v4  ;;  %v3900_v11 = vsel %vm1210_vm3, %v1967_v7, %v1966_v6  ;;  %v1636_v47 = vpack.c.b16 %v3888_v2, %v3888_v2  ;;  %v3266_v59 = vld [vmem:[#allocation7 + $0x1a0] sm:$0xff]   ;;  %v3268_v61 = vld [vmem:[#allocation7 + $0x1b0] sm:$0xff]   ;;  %v3269_v62 = vld [vmem:[#allocation7 + $0x1b8] sm:$0xff]  }
 0x48c   :  { %2871 = vmatprep.subr.bf16.mxu1 %v3393_v0  ;;  %v1747_v55 = vpack.c.b16 %v3893_v9, %v3893_v9  ;;  %v3270_v1 = vld [vmem:[#allocation7 + $0x1c0] sm:$0xff]   ;;  %v1858_v63 = vpack.c.b16 %v3897_v10, %v3897_v10  ;;  %v3271_v2 = vld [vmem:[#allocation7 + $0x1c8] sm:$0xff]   ;;  %v3272_v3 = vld [vmem:[#allocation7 + $0x1d0] sm:$0xff]   ;;  %v1969_v9 = vpack.c.b16 %v3900_v11, %v3900_v11 }
 0x48d   :  { %v3273_v4 = vld [vmem:[#allocation7 + $0x1d8] sm:$0xff]   ;;  %v3274_v5 = vld [vmem:[#allocation7 + $0x1e0] sm:$0xff]   ;;  %v3275_v6 = vld [vmem:[#allocation7 + $0x1e8] sm:$0xff]  }
 0x48e   :  { %v3276_v7 = vld [vmem:[#allocation7 + $0x1f0] sm:$0xff]   ;;  %v3278_v10 = vld [vmem:[#allocation9] sm:$0xff]   ;;  %v3283_v11 = vld [vmem:[#allocation9 + $0x28] sm:$0xff]  }
 0x48f   :  { %2872 = vmatpush3.bf16.msra.mxu1 %v3223_v8  ;;  %v3277_v8 = vld [vmem:[#allocation7 + $0x1f8] sm:$0xff]   ;;  %3010 = vmatpush3.bf16.msra.mxu0 %v3278_v10 }
 0x490   :  { %2873 = vmatprep.subr.bf16.mxu1 %v3393_v0  ;;  %3011 = vmatprep.subr.bf16.mxu0 %v3393_v0 }
 0x493   :  { %2874 = vmatpush3.bf16.msra.mxu1 %v3224_v12  ;;  %v3279_v12 = vld [vmem:[#allocation9 + $0x8] sm:$0xff]  }
 0x494   :  { %2875 = vmatprep.subr.bf16.mxu1 %v3393_v0  ;;  %3012 = vmatpush3.bf16.msra.mxu0 %v3279_v12 }
 0x495   :  { %3013 = vmatprep.subr.bf16.mxu0 %v3393_v0 }
 0x497   :  { %2876 = vmatpush3.bf16.msra.mxu1 %v3225_v13  ;;  %v3280_v13 = vld [vmem:[#allocation9 + $0x10] sm:$0xff]  }
 0x498   :  { %2877 = vmatprep.subr.bf16.mxu1 %v3393_v0  ;;  %3014 = vmatpush3.bf16.msra.mxu0 %v3280_v13 }
 0x499   :  { %3015 = vmatprep.subr.bf16.mxu0 %v3393_v0 }
 0x49b   :  { %2878 = vmatpush3.bf16.msra.mxu1 %v3226_v14  ;;  %v3281_v14 = vld [vmem:[#allocation9 + $0x18] sm:$0xff]  }
 0x49c   :  { %2879 = vmatprep.subr.bf16.mxu1 %v3393_v0  ;;  %3016 = vmatpush3.bf16.msra.mxu0 %v3281_v14 }
 0x49d   :  { %3017 = vmatprep.subr.bf16.mxu0 %v3393_v0 }
 0x49f   :  { %2880 = vmatpush3.bf16.msra.mxu1 %v3227_v15  ;;  %v3282_v15 = vld [vmem:[#allocation9 + $0x20] sm:$0xff]  }
 0x4a0   :  { %2881 = vmatprep.subr.bf16.mxu1 %v3393_v0  ;;  %3018 = vmatpush3.bf16.msra.mxu0 %v3282_v15 }
 0x4a1   :  { %3019 = vmatprep.subr.bf16.mxu0 %v3393_v0 }
 0x4a3   :  { %2882 = vmatpush3.bf16.msra.mxu1 %v3228_v16  ;;  %v3284_v16 = vld [vmem:[#allocation9 + $0x30] sm:$0xff]  }
 0x4a4   :  { %2883 = vmatprep.subr.bf16.mxu1 %v3393_v0  ;;  %3020 = vmatpush3.bf16.msra.mxu0 %v3283_v11  ;;  %v2417_v11 = vld [vmem:[%s4028_s13] ss:$0 sm:$0xff] }
 0x4a5   :  { %3021 = vmatprep.subr.bf16.mxu0 %v3393_v0 }
 0x4a7   :  { %2884 = vmatpush3.bf16.msra.mxu1 %v3229_v17  ;;  %v3285_v17 = vld [vmem:[#allocation9 + $0x38] sm:$0xff]  }
 0x4a8   :  { %2889 = vmatprep.subr.bf16.mxu1 %v3393_v0  ;;  %3022 = vmatpush3.bf16.msra.mxu0 %v3284_v16 }
 0x4a9   :  { %3023 = vmatprep.subr.bf16.mxu0 %v3393_v0 }
 0x4aa   :  { %2886 = vmatmul.mubr.bf16.vlgmr.msra.gmra.mrb[4].mxu1 %v1304_v19 }
 0x4ab   :  { %2890 = vmatpush3.bf16.msra.mxu1 %v3230_v18  ;;  %2905 = vmatprep.mubr.msk.bf16.mxu1 %vm3395_vm2, %v3393_v0 }
 0x4ac   :  { %2891 = vmatprep.subr.bf16.mxu1 %v3393_v0  ;;  %3024 = vmatpush3.bf16.msra.mxu0 %v3285_v17  ;;  %v2418_v17 = vld [vmem:[%s4029_s14] ss:$0 sm:$0xff] }
 0x4af   :  { %2892 = vmatpush3.bf16.msra.mxu1 %v3231_v20 }
 0x4b0   :  { %2893 = vmatprep.subr.bf16.mxu1 %v3393_v0 }
 0x4b3   :  { %2894 = vmatpush3.bf16.msra.mxu1 %v3232_v21 }
 0x4b4   :  { %2895 = vmatprep.subr.bf16.mxu1 %v3393_v0 }
 0x4b7   :  { %2896 = vmatpush3.bf16.msra.mxu1 %v3233_v22 }
 0x4b8   :  { %2897 = vmatprep.subr.bf16.mxu1 %v3393_v0 }
 0x4bb   :  { %2898 = vmatpush3.bf16.msra.mxu1 %v3234_v23 }
 0x4bc   :  { %2899 = vmatprep.subr.bf16.mxu1 %v3393_v0 }
 0x4bf   :  { %2900 = vmatpush3.bf16.msra.mxu1 %v3235_v24 }
 0x4c0   :  { %2901 = vmatprep.subr.bf16.mxu1 %v3393_v0 }
 0x4c3   :  { %2902 = vmatpush3.bf16.msra.mxu1 %v3236_v25 }
 0x4c4   :  { %2903 = vmatprep.subr.bf16.mxu1 %v3393_v0 }
 0x4c7   :  { %2904 = vmatpush3.bf16.msra.mxu1 %v3237_v26 }
 0x4c8   :  { %2909 = vmatprep.subr.bf16.mxu1 %v3393_v0 }
 0x4ca   :  { %2906 = vmatmul.mubr.bf16.vlgmr.msra.gmra.mrb[4].mxu1 %v1414_v28 }
 0x4cb   :  { %2910 = vmatpush3.bf16.msra.mxu1 %v3238_v27  ;;  %2925 = vmatprep.mubr.msk.bf16.mxu1 %vm3395_vm2, %v3393_v0 }
 0x4cc   :  { %2911 = vmatprep.subr.bf16.mxu1 %v3393_v0 }
 0x4cf   :  { %2912 = vmatpush3.bf16.msra.mxu1 %v3239_v29 }
 0x4d0   :  { %2913 = vmatprep.subr.bf16.mxu1 %v3393_v0 }
 0x4d3   :  { %2914 = vmatpush3.bf16.msra.mxu1 %v3240_v30 }
 0x4d4   :  { %2915 = vmatprep.subr.bf16.mxu1 %v3393_v0 }
 0x4d7   :  { %2916 = vmatpush3.bf16.msra.mxu1 %v3241_v31 }
 0x4d8   :  { %2917 = vmatprep.subr.bf16.mxu1 %v3393_v0 }
 0x4db   :  { %2918 = vmatpush3.bf16.msra.mxu1 %v3242_v32 }
 0x4dc   :  { %2919 = vmatprep.subr.bf16.mxu1 %v3393_v0 }
 0x4df   :  { %2920 = vmatpush3.bf16.msra.mxu1 %v3243_v33 }
 0x4e0   :  { %2921 = vmatprep.subr.bf16.mxu1 %v3393_v0 }
 0x4e3   :  { %2922 = vmatpush3.bf16.msra.mxu1 %v3244_v35 }
 0x4e4   :  { %2923 = vmatprep.subr.bf16.mxu1 %v3393_v0 }
 0x4e7   :  { %2924 = vmatpush3.bf16.msra.mxu1 %v3245_v36 }
 0x4e8   :  { %2929 = vmatprep.subr.bf16.mxu1 %v3393_v0 }
 0x4ea   :  { %2926 = vmatmul.mubr.bf16.vlgmr.msra.gmra.mrb[4].mxu1 %v1525_v38 }
 0x4eb   :  { %2930 = vmatpush3.bf16.msra.mxu1 %v3246_v37  ;;  %2945 = vmatprep.mubr.msk.bf16.mxu1 %vm3395_vm2, %v3393_v0 }
 0x4ec   :  { %2931 = vmatprep.subr.bf16.mxu1 %v3393_v0 }
 0x4ef   :  { %2932 = vmatpush3.bf16.msra.mxu1 %v3247_v39 }
 0x4f0   :  { %2933 = vmatprep.subr.bf16.mxu1 %v3393_v0 }
 0x4f3   :  { %2934 = vmatpush3.bf16.msra.mxu1 %v3248_v40 }
 0x4f4   :  { %2935 = vmatprep.subr.bf16.mxu1 %v3393_v0 }
 0x4f7   :  { %2936 = vmatpush3.bf16.msra.mxu1 %v3249_v41 }
 0x4f8   :  { %2937 = vmatprep.subr.bf16.mxu1 %v3393_v0 }
 0x4fb   :  { %2938 = vmatpush3.bf16.msra.mxu1 %v3250_v42 }
 0x4fc   :  { %2939 = vmatprep.subr.bf16.mxu1 %v3393_v0 }
 0x4ff   :  { %2940 = vmatpush3.bf16.msra.mxu1 %v3251_v43 }
 0x500   :  { %2941 = vmatprep.subr.bf16.mxu1 %v3393_v0 }
 0x503   :  { %2942 = vmatpush3.bf16.msra.mxu1 %v3252_v44 }
 0x504   :  { %2943 = vmatprep.subr.bf16.mxu1 %v3393_v0 }
 0x507   :  { %2944 = vmatpush3.bf16.msra.mxu1 %v3253_v46  ;;  %v2407_v46 = vld [vmem:[%s4025_s10] ss:$0 sm:$0xff] }
 0x508   :  { %2949 = vmatprep.subr.bf16.mxu1 %v3393_v0 }
 0x50a   :  { %2946 = vmatmul.mubr.bf16.vlgmr.msra.gmra.mrb[4].mxu1 %v1636_v47  ;;  %v2408_v47 = vld [vmem:[%s4026_s11] ss:$0 sm:$0xff] }
 0x50b   :  { %2950 = vmatpush3.bf16.msra.mxu1 %v3254_v45  ;;  %2965 = vmatprep.mubr.msk.bf16.mxu1 %vm3395_vm2, %v3393_v0 }
 0x50c   :  { %2951 = vmatprep.subr.bf16.mxu1 %v3393_v0 }
 0x50f   :  { %2952 = vmatpush3.bf16.msra.mxu1 %v3255_v49 }
 0x510   :  { %2953 = vmatprep.subr.bf16.mxu1 %v3393_v0 }
 0x513   :  { %2954 = vmatpush3.bf16.msra.mxu1 %v3256_v48 }
 0x514   :  { %2955 = vmatprep.subr.bf16.mxu1 %v3393_v0 }
 0x517   :  { %2956 = vmatpush3.bf16.msra.mxu1 %v3257_v50 }
 0x518   :  { %2957 = vmatprep.subr.bf16.mxu1 %v3393_v0 }
 0x51b   :  { %2958 = vmatpush3.bf16.msra.mxu1 %v3258_v34 }
 0x51c   :  { %2959 = vmatprep.subr.bf16.mxu1 %v3393_v0 }
 0x51f   :  { %2960 = vmatpush3.bf16.msra.mxu1 %v3259_v51 }
 0x520   :  { %2961 = vmatprep.subr.bf16.mxu1 %v3393_v0 }
 0x523   :  { %2962 = vmatpush3.bf16.msra.mxu1 %v3260_v52 }
 0x524   :  { %2963 = vmatprep.subr.bf16.mxu1 %v3393_v0 }
 0x527   :  { %2964 = vmatpush3.bf16.msra.mxu1 %v3261_v53 }
 0x528   :  { %2969 = vmatprep.subr.bf16.mxu1 %v3393_v0 }
 0x52a   :  { %2966 = vmatmul.mubr.bf16.vlgmr.msra.gmra.mrb[4].mxu1 %v1747_v55 }
 0x52b   :  { %2970 = vmatpush3.bf16.msra.mxu1 %v3262_v54  ;;  %2985 = vmatprep.mubr.msk.bf16.mxu1 %vm3395_vm2, %v3393_v0 }
 0x52c   :  { %2971 = vmatprep.subr.bf16.mxu1 %v3393_v0 }
 0x52f   :  { %2972 = vmatpush3.bf16.msra.mxu1 %v3263_v56 }
 0x530   :  { %2973 = vmatprep.subr.bf16.mxu1 %v3393_v0 }
 0x533   :  { %2974 = vmatpush3.bf16.msra.mxu1 %v3264_v57 }
 0x534   :  { %2975 = vmatprep.subr.bf16.mxu1 %v3393_v0 }
 0x537   :  { %2976 = vmatpush3.bf16.msra.mxu1 %v3265_v58 }
 0x538   :  { %2977 = vmatprep.subr.bf16.mxu1 %v3393_v0 }
 0x53b   :  { %2978 = vmatpush3.bf16.msra.mxu1 %v3266_v59 }
 0x53c   :  { %2979 = vmatprep.subr.bf16.mxu1 %v3393_v0 }
 0x53f   :  { %2980 = vmatpush3.bf16.msra.mxu1 %v3267_v60 }
 0x540   :  { %2981 = vmatprep.subr.bf16.mxu1 %v3393_v0 }
 0x543   :  { %2982 = vmatpush3.bf16.msra.mxu1 %v3268_v61 }
 0x544   :  { %2983 = vmatprep.subr.bf16.mxu1 %v3393_v0 }
 0x547   :  { %2984 = vmatpush3.bf16.msra.mxu1 %v3269_v62 }
 0x548   :  { %2989 = vmatprep.subr.bf16.mxu1 %v3393_v0 }
 0x54a   :  { %2986 = vmatmul.mubr.bf16.vlgmr.msra.gmra.mrb[4].mxu1 %v1858_v63 }
 0x54b   :  { %2990 = vmatpush3.bf16.msra.mxu1 %v3270_v1  ;;  %3005 = vmatprep.mubr.msk.bf16.mxu1 %vm3395_vm2, %v3393_v0 }
 0x54c   :  { %2991 = vmatprep.subr.bf16.mxu1 %v3393_v0 }
 0x54f   :  { %2992 = vmatpush3.bf16.msra.mxu1 %v3271_v2 }
 0x550   :  { %2993 = vmatprep.subr.bf16.mxu1 %v3393_v0 }
 0x553   :  { %2994 = vmatpush3.bf16.msra.mxu1 %v3272_v3 }
 0x554   :  { %2995 = vmatprep.subr.bf16.mxu1 %v3393_v0 }
 0x557   :  { %2996 = vmatpush3.bf16.msra.mxu1 %v3273_v4 }
 0x558   :  { %2997 = vmatprep.subr.bf16.mxu1 %v3393_v0 }
 0x55b   :  { %2998 = vmatpush3.bf16.msra.mxu1 %v3274_v5 }
 0x55c   :  { %2999 = vmatprep.subr.bf16.mxu1 %v3393_v0 }
 0x55f   :  { %3000 = vmatpush3.bf16.msra.mxu1 %v3275_v6 }
 0x560   :  { %3001 = vmatprep.subr.bf16.mxu1 %v3393_v0 }
 0x563   :  { %3002 = vmatpush3.bf16.msra.mxu1 %v3276_v7 }
 0x564   :  { %3003 = vmatprep.subr.bf16.mxu1 %v3393_v0 }
 0x567   :  { %3004 = vmatpush3.bf16.msra.mxu1 %v3277_v8 }
 0x56a   :  { %3006 = vmatmul.mubr.bf16.vlgmr.msra.gmra.mrb[4].mxu1 %v1969_v9 }
 0x63d   :  { %v2053_v18 = vpop.f32.mrb[4].mxu1 }
 0x63e   :  { %v2061_v19 = vsel %vm2060_vm4, %v2053_v18, 0.0  ;;  %v2070_v20 = vmul.f32 %v2053_v18, %v2053_v18  ;;  %v3007_v21 = vpop.f32.mrb[5].mxu1 }
 0x63f   :  { %v2062_v22 = vrot.slane %v2061_v19, 4  ;;  %v2056_v23 = vpop.f32.mrb[6].mxu1 }
 0x640   :  { %v2071_v24 = vsel %vm2060_vm4, %v2070_v20, 0.0  ;;  %v3008_v25 = vpop.f32.mrb[7].mxu1 }
 0x641   :  { %v2063_v26 = vadd.f32 %v2062_v22, %v2061_v19  ;;  %v2072_v27 = vrot.slane %v2071_v24, 4 }
 0x643   :  { %v2064_v28 = vrot.slane %v2063_v26, 2  ;;  %v2073_v29 = vadd.f32 %v2072_v27, %v2071_v24 }
 0x645   :  { %v2065_v30 = vadd.f32 %v2064_v28, %v2063_v26  ;;  %v2074_v31 = vrot.slane %v2073_v29, 2 }
 0x647   :  { %v2066_v32 = vrot.slane %v2065_v30, 1  ;;  %v2075_v0 = vadd.f32 %v2074_v31, %v2073_v29 }
 0x649   :  { %v2067_v33 = vadd.f32 %v2066_v32, %v2065_v30  ;;  %v2076_v35 = vrot.slane %v2075_v0, 1 }
 0x64b   :  { %v2069_v36 = vmul.f32 0.5, %v2067_v33  ;;  %v2077_v37 = vadd.f32 %v2076_v35, %v2075_v0 }
 0x64d   :  { %v2078_v38 = vmul.f32 0.5, %v2077_v37  ;;  %v2079_v39 = vmul.f32 %v2069_v36, %v2069_v36  ;;  %v2082_v43 = vsub.f32 %v2053_v18, %v2069_v36 }
 0x64f   :  { %v2080_v40 = vsub.f32 %v2078_v38, %v2079_v39 }
 0x651   :  { %v2081_v41 = vmax.f32 %v2080_v40, 0.0 }
 0x653   :  { %v2083_v42 = vadd.f32 1e-05, %v2081_v41 }
 0x655   :  { %3290 = vrsqrt.f32 %v2083_v42 }
 0x65f   :  { %v3291_v44 = vpop.eup %3290 }
 0x660   :  { %v2085_v45 = vmul.f32 %v3291_v44, %v2082_v43 }
 0x662   :  { %v2093_v49 = vmul.f32 %v2407_v46, %v2085_v45 }
 0x664   :  { %v2101_v48 = vadd.f32 %v2408_v47, %v2093_v49 }
 0x666   :  { %v2102_v50 = vmax.f32 %v2101_v48, 0.0 }
 0x668   :  { %v2103_v34 = vpack.c.bf16 %v2102_v50, %v2102_v50 }
 0x66a   :  { %3026 = vmatmul.mubr.bf16.vlgmr.msra.gmra.mrb[16].mxu0 %v2103_v34 }
 0x73d   :  { %v2202_v51 = vpop.f32.mrb[16].mxu0 }
 0x73e   :  { %v2208_v52 = vsel %vm2060_vm4, %v2202_v51, 0.0  ;;  %v2216_v53 = vmul.f32 %v2202_v51, %v2202_v51  ;;  %v3027_v54 = vpop.f32.mrb[17].mxu0 }
 0x73f   :  { %v2209_v55 = vrot.slane %v2208_v52, 4  ;;  %v2205_v56 = vpop.f32.mrb[18].mxu0 }
 0x740   :  { %v2217_v57 = vsel %vm2060_vm4, %v2216_v53, 0.0  ;;  %v3028_v58 = vpop.f32.mrb[19].mxu0 }
 0x741   :  { %v2210_v59 = vadd.f32 %v2209_v55, %v2208_v52  ;;  %v2218_v60 = vrot.slane %v2217_v57, 4 }
 0x743   :  { %v2211_v61 = vrot.slane %v2210_v59, 2  ;;  %v2219_v62 = vadd.f32 %v2218_v60, %v2217_v57 }
 0x745   :  { %v2212_v1 = vadd.f32 %v2211_v61, %v2210_v59  ;;  %v2220_v63 = vrot.slane %v2219_v62, 2 }
 0x747   :  { %v2213_v2 = vrot.slane %v2212_v1, 1  ;;  %v2221_v3 = vadd.f32 %v2220_v63, %v2219_v62 }
 0x749   :  { %v2214_v4 = vadd.f32 %v2213_v2, %v2212_v1  ;;  %v2222_v5 = vrot.slane %v2221_v3, 1 }
 0x74b   :  { %v2215_v6 = vmul.f32 0.5, %v2214_v4  ;;  %v2223_v7 = vadd.f32 %v2222_v5, %v2221_v3 }
 0x74d   :  { %v2224_v8 = vmul.f32 0.5, %v2223_v7  ;;  %v2225_v9 = vmul.f32 %v2215_v6, %v2215_v6  ;;  %v2228_v14 = vsub.f32 %v2202_v51, %v2215_v6 }
 0x74f   :  { %v2226_v10 = vsub.f32 %v2224_v8, %v2225_v9 }
 0x751   :  { %v2227_v12 = vmax.f32 %v2226_v10, 0.0 }
 0x753   :  { %v2229_v13 = vadd.f32 1e-05, %v2227_v12 }
 0x755   :  { %3292 = vrsqrt.f32 %v2229_v13 }
 0x75f   :  { %v3293_v15 = vpop.eup %3292 }
 0x760   :  { %v2231_v16 = vmul.f32 %v3293_v15, %v2228_v14 }
 0x762   :  { %v2239_v18 = vmul.f32 %v2417_v11, %v2231_v16 }
 0x764   :  { %v2247_v19 = vadd.f32 %v2418_v17, %v2239_v18 }
 0x766   :  { %2248 = vst [vmem:[#allocation10] sm:$0x3] %v2247_v19 }
 0x767   :  { %3371 = shalt.err (!%p3368_p0)
}
 0x768   :  { %s3372_s0 = scalar_lea.hbm %s4030_s15, 32 }
 0x769   :  { %p3373_p1 = scmp.ne.s32.totalorder %s4030_s15, %s3372_s0  ;;  %p3376_p2 = scmp.lt.u32.totalorder %s3372_s0, %s4030_s15 }
 0x76b   :  { %p3378_p3 = pnand %p3376_p2, %p3373_p1 }
 0x76d   :  { %3381 = shalt.err (!%p3378_p3)
}
 0x76e   :  { %2258 = dma.vmem_to_hbm [thread:$0]  %s2256_s19, 32, %s4030_s15, [#allocation6]  }
 0x76f   :  { %3386 = dma.done.wait [#allocation6], 32  }
 0x770   :  { %3387 = vsyncadd [#allocation6], 4294967264 }
 0x771   :  { %2262 = vsyncpa [#allocation5], 1 }
 0x772   :  { %2263 = vsyncpa [#allocation8], 1 }
 0x773   :  { %2264 = vsyncpa [#allocation6], 1 }

</bundles_post_ra>
